<compile_context>
chip_gen: v7x
topology: tpu7x:2x2x1
jax: 0.10.0
libtpu: 0.0.40
codegen_flags: <defaults>
</compile_context>

<pallas_src>
import functools

import jax
import jax.numpy as jnp
from jax.experimental import pallas as pl
from jax.experimental.pallas import tpu as pltpu


# Layer widths from ANN_Model.__init__ (in -> ... -> out)
LAYER_SIZES = [11, 128, 128, 128, 64, 64, 32, 16, 1]
NUM_LAYERS = len(LAYER_SIZES) - 1          # 8 linear layers
PADDED_IN = 16                             # first-layer fan-in padded 11 -> 16
SUB_M = 256                                # in-kernel sub-block rows (MXU row dim)
MAX_TM = 4096                              # batch-tile cap (multiple of SUB_M)


def _cdiv(a, b):
    return -(-a // b)


def _choose_tiling(batch):
    """Pick (tile_m, num_tiles): tile_m a multiple of SUB_M, <= MAX_TM,
    >= 2 tiles whenever possible (v7x megacore), minimal batch padding."""
    n_sub = max(1, _cdiv(batch, SUB_M))            # 256-row sub-blocks needed
    max_sub_per_tile = MAX_TM // SUB_M
    min_tiles = 2 if n_sub >= 2 else 1
    num_tiles = max(min_tiles, _cdiv(n_sub, max_sub_per_tile))
    sub_per_tile = _cdiv(n_sub, num_tiles)
    return sub_per_tile * SUB_M, num_tiles


def _ann_kernel(*refs, num_sub):
    """refs = (x_ref, w0, b0, ..., w6, b6, w7_row, b7, out_ref).

    x_ref  : (TM, 16) bf16 tile of the (feature-padded) batch.
    wi     : (K, N) bf16, VMEM-resident across grid steps (constant index_map).
    bi     : (1, N) f32.
    w7_row : (1, 16) bf16 (final layer weight, pre-transposed for the VPU path).
    b7     : (1, 1)  f32.

    For each 256-row sub-block: 7 MXU matmuls with f32 accumulation + f32
    bias/ReLU on the VPU, activations re-rounded to bf16 only as the next MXU
    input; the final 16->1 layer is a VPU broadcast-multiply + lane reduce.
    """
    x_ref = refs[0]
    out_ref = refs[-1]
    p = refs[1:-1]

    # Loop-invariant tail-layer operands, hoisted out of the sub-block loop.
    w_last = p[2 * (NUM_LAYERS - 1)][...].astype(jnp.float32)      # (1, 16)
    b_last = p[2 * (NUM_LAYERS - 1) + 1][...]                      # (1, 1) f32

    @pl.loop(0, num_sub)
    def _(s):
        row = pl.multiple_of(s * SUB_M, SUB_M)
        h = x_ref[pl.ds(row, SUB_M), :]                            # bf16 (SUB_M, 16)
        for layer in range(NUM_LAYERS - 1):                        # layers 0..6 on MXU
            w = p[2 * layer][...]                                  # bf16 (K, N)
            b = p[2 * layer + 1][...]                              # f32  (1, N)
            y = jnp.dot(h, w, preferred_element_type=jnp.float32) + b
            h = jnp.maximum(y, 0.0).astype(jnp.bfloat16)
        # Final 16 -> 1 layer on the VPU/XLU instead of the MXU.
        hf = h.astype(jnp.float32)                                 # (SUB_M, 16)
        y = jnp.sum(hf * w_last, axis=-1, keepdims=True) + b_last  # (SUB_M, 1)
        out_ref[pl.ds(row, SUB_M), :] = y.astype(out_ref.dtype)


def ann_forward(x, params):
    """x: (B, 11) float32. params: list of (W_(in,out) f32, b_(1,out) f32).

    Returns (B, 1) float32.
    """
    batch = x.shape[0]
    tile_m, num_tiles = _choose_tiling(batch)
    b_pad = tile_m * num_tiles
    num_sub = tile_m // SUB_M

    # ---- host-side prep: feature padding, batch padding, bf16 casts --------
    x_p = jnp.zeros((b_pad, PADDED_IN), jnp.float32)
    x_p = x_p.at[:batch, : LAYER_SIZES[0]].set(x)
    x_p = x_p.astype(jnp.bfloat16)

    flat_params = []
    for i, (w, b) in enumerate(params):
        if i == 0:
            w_full = jnp.zeros((PADDED_IN, LAYER_SIZES[1]), jnp.float32)
            w_full = w_full.at[: LAYER_SIZES[0], :].set(w)
            flat_params += [w_full.astype(jnp.bfloat16), b.astype(jnp.float32)]
        elif i == NUM_LAYERS - 1:
            # Final 16->1 layer runs on the VPU: pass W pre-transposed (1, 16).
            flat_params += [w.T.astype(jnp.bfloat16), b.astype(jnp.float32)]
        else:
            flat_params += [w.astype(jnp.bfloat16), b.astype(jnp.float32)]

    # ---- BlockSpecs ---------------------------------------------------------
    in_specs = [pl.BlockSpec((tile_m, PADDED_IN), lambda i: (i, 0))]
    for prm in flat_params:
        # Weights / biases: full-array blocks, constant index -> VMEM-resident.
        in_specs.append(pl.BlockSpec(prm.shape, lambda i: (0, 0)))

    out_spec = pl.BlockSpec((tile_m, LAYER_SIZES[-1]), lambda i: (i, 0))
    out_shape = jax.ShapeDtypeStruct((b_pad, LAYER_SIZES[-1]), jnp.float32)

    # ---- advisory cost estimate --------------------------------------------
    padded_sizes = [PADDED_IN] + LAYER_SIZES[1:]
    contractions = sum(
        padded_sizes[i] * padded_sizes[i + 1] for i in range(NUM_LAYERS)
    )
    flops = 2 * b_pad * contractions
    bytes_accessed = (
        b_pad * PADDED_IN * 2              # x tile (bf16)
        + b_pad * LAYER_SIZES[-1] * 4      # output (f32)
        + 2 * contractions                 # bf16 weights
        + 4 * sum(LAYER_SIZES[1:])         # f32 biases
    )
    cost = pl.CostEstimate(
        flops=flops, transcendentals=0, bytes_accessed=bytes_accessed
    )

    out = pl.pallas_call(
        functools.partial(_ann_kernel, num_sub=num_sub),
        grid=(num_tiles,),
        in_specs=in_specs,
        out_specs=out_spec,
        out_shape=out_shape,
        compiler_params=pltpu.CompilerParams(
            dimension_semantics=("parallel",),
            vmem_limit_bytes=32 << 20,     # total footprint is well under 1 MiB
        ),
        cost_estimate=cost,
    )(x_p, *flat_params)

    return out[:batch, :]


def init_params(key):
    """Deterministic params matching PyTorch nn.Linear default init:
    U(-1/sqrt(fan_in), 1/sqrt(fan_in)) for weight and bias.
    Weights are returned pre-transposed as (in, out)."""
    params = []
    for i in range(NUM_LAYERS):
        fan_in, fan_out = LAYER_SIZES[i], LAYER_SIZES[i + 1]
        key, kw, kb = jax.random.split(key, 3)
        bound = 1.0 / jnp.sqrt(jnp.float32(fan_in))
        w = jax.random.uniform(kw, (fan_in, fan_out), jnp.float32, -bound, bound)
        b = jax.random.uniform(kb, (1, fan_out), jnp.float32, -bound, bound)
        params.append((w, b))
    return params


def reference_forward(x, params):
    """Pure-JAX reference emulating the kernel's numerics: bf16 weights and
    bf16-rounded activations, f32 accumulation / bias / ReLU."""
    h = x.astype(jnp.float32)
    for i, (w, b) in enumerate(params):
        h_b = h.astype(jnp.bfloat16).astype(jnp.float32)
        w_b = w.astype(jnp.bfloat16).astype(jnp.float32)
        h = jnp.dot(h_b, w_b, precision=jax.lax.Precision.HIGHEST) + b
        if i < NUM_LAYERS - 1:
            h = jnp.maximum(h, 0.0)
    return h


if __name__ == "__main__":
    key = jax.random.PRNGKey(0)
    params = init_params(key)

    # Small-batch check (single tile, single sub-block).
    key, kx = jax.random.split(key)
    batch = 8
    x = jax.random.normal(kx, (batch, LAYER_SIZES[0]), jnp.float32)
    out = jax.block_until_ready(ann_forward(x, params))
    ref = reference_forward(x, params)
    assert out.shape == (batch, 1), out.shape
    assert jnp.allclose(out, ref, atol=5e-3, rtol=5e-3), "mismatch (batch=8)"

    # Multi-tile / multi-sub-block check (2 grid tiles, 2 sub-blocks per tile).
    key, kx2 = jax.random.split(key)
    batch2 = 600
    x2 = jax.random.normal(kx2, (batch2, LAYER_SIZES[0]), jnp.float32)
    out2 = jax.block_until_ready(ann_forward(x2, params))
    ref2 = reference_forward(x2, params)
    assert out2.shape == (batch2, 1), out2.shape
    assert jnp.allclose(out2, ref2, atol=5e-3, rtol=5e-3), "mismatch (batch=600)"

    print("KERNEL_OK")
</pallas_src>

<mosaic_0001>
module attributes {stable_mosaic.version = 11 : i64} {
  func.func @_ann_kernel(%arg0: i32, %arg1: memref<256x16xbf16, #tpu.memory_space<vmem>>, %arg2: memref<16x128xbf16, #tpu.memory_space<vmem>>, %arg3: memref<1x128xf32, #tpu.memory_space<vmem>>, %arg4: memref<128x128xbf16, #tpu.memory_space<vmem>>, %arg5: memref<1x128xf32, #tpu.memory_space<vmem>>, %arg6: memref<128x128xbf16, #tpu.memory_space<vmem>>, %arg7: memref<1x128xf32, #tpu.memory_space<vmem>>, %arg8: memref<128x64xbf16, #tpu.memory_space<vmem>>, %arg9: memref<1x64xf32, #tpu.memory_space<vmem>>, %arg10: memref<64x64xbf16, #tpu.memory_space<vmem>>, %arg11: memref<1x64xf32, #tpu.memory_space<vmem>>, %arg12: memref<64x32xbf16, #tpu.memory_space<vmem>>, %arg13: memref<1x32xf32, #tpu.memory_space<vmem>>, %arg14: memref<32x16xbf16, #tpu.memory_space<vmem>>, %arg15: memref<1x16xf32, #tpu.memory_space<vmem>>, %arg16: memref<1x16xbf16, #tpu.memory_space<vmem>>, %arg17: memref<1x1xf32, #tpu.memory_space<vmem>>, %arg18: memref<256x1xf32, #tpu.memory_space<vmem>>) attributes {dimension_semantics = [#tpu.dimension_semantics<parallel>], iteration_bounds = array<i64: 1>, scalar_prefetch = 0 : i64, scratch_operands = 0 : i64, tpu.core_type = #tpu.core_type<tc>, window_params = [{transform_indices = @transform_0, window_bounds = array<i64: 256, 16>}, {pipeline_mode = #tpu.pipeline_mode<synchronous>, transform_indices = @transform_1, window_bounds = array<i64: 16, 128>}, {pipeline_mode = #tpu.pipeline_mode<synchronous>, transform_indices = @transform_2, window_bounds = array<i64: 1, 128>}, {pipeline_mode = #tpu.pipeline_mode<synchronous>, transform_indices = @transform_3, window_bounds = array<i64: 128, 128>}, {pipeline_mode = #tpu.pipeline_mode<synchronous>, transform_indices = @transform_4, window_bounds = array<i64: 1, 128>}, {pipeline_mode = #tpu.pipeline_mode<synchronous>, transform_indices = @transform_5, window_bounds = array<i64: 128, 128>}, {pipeline_mode = #tpu.pipeline_mode<synchronous>, transform_indices = @transform_6, window_bounds = array<i64: 1, 128>}, {pipeline_mode = #tpu.pipeline_mode<synchronous>, transform_indices = @transform_7, window_bounds = array<i64: 128, 64>}, {pipeline_mode = #tpu.pipeline_mode<synchronous>, transform_indices = @transform_8, window_bounds = array<i64: 1, 64>}, {pipeline_mode = #tpu.pipeline_mode<synchronous>, transform_indices = @transform_9, window_bounds = array<i64: 64, 64>}, {pipeline_mode = #tpu.pipeline_mode<synchronous>, transform_indices = @transform_10, window_bounds = array<i64: 1, 64>}, {pipeline_mode = #tpu.pipeline_mode<synchronous>, transform_indices = @transform_11, window_bounds = array<i64: 64, 32>}, {pipeline_mode = #tpu.pipeline_mode<synchronous>, transform_indices = @transform_12, window_bounds = array<i64: 1, 32>}, {pipeline_mode = #tpu.pipeline_mode<synchronous>, transform_indices = @transform_13, window_bounds = array<i64: 32, 16>}, {pipeline_mode = #tpu.pipeline_mode<synchronous>, transform_indices = @transform_14, window_bounds = array<i64: 1, 16>}, {pipeline_mode = #tpu.pipeline_mode<synchronous>, transform_indices = @transform_15, window_bounds = array<i64: 1, 16>}, {pipeline_mode = #tpu.pipeline_mode<synchronous>, transform_indices = @transform_16, window_bounds = array<i64: 1, 1>}, {transform_indices = @transform_17, window_bounds = array<i64: 256, 1>}]} {
    %c0 = arith.constant 0 : index
    %c0_0 = arith.constant 0 : index
    %0 = vector.load %arg16[%c0, %c0_0] : memref<1x16xbf16, #tpu.memory_space<vmem>>, vector<1x16xbf16>
    %1 = arith.extf %0 : vector<1x16xbf16> to vector<1x16xf32>
    %c0_1 = arith.constant 0 : index
    %c0_2 = arith.constant 0 : index
    %2 = vector.load %arg17[%c0_1, %c0_2] : memref<1x1xf32, #tpu.memory_space<vmem>>, vector<1x1xf32>
    %c0_i32 = arith.constant 0 : i32
    %c1_i32 = arith.constant 1 : i32
    %3 = arith.muli %c0_i32, %c1_i32 : i32
    %c0_i32_3 = arith.constant 0 : i32
    %4 = arith.addi %c0_i32_3, %3 : i32
    %c256_i32 = arith.constant 256 : i32
    %5 = arith.muli %4, %c256_i32 : i32
    %6 = tpu.assume_multiple %5, 256 : i32
    %7 = arith.index_cast %6 : i32 to index
    %c0_4 = arith.constant 0 : index
    %8 = vector.load %arg1[%7, %c0_4] : memref<256x16xbf16, #tpu.memory_space<vmem>>, vector<256x16xbf16>
    %c0_5 = arith.constant 0 : index
    %c0_6 = arith.constant 0 : index
    %9 = vector.load %arg2[%c0_5, %c0_6] : memref<16x128xbf16, #tpu.memory_space<vmem>>, vector<16x128xbf16>
    %c0_7 = arith.constant 0 : index
    %c0_8 = arith.constant 0 : index
    %10 = vector.load %arg3[%c0_7, %c0_8] : memref<1x128xf32, #tpu.memory_space<vmem>>, vector<1x128xf32>
    %cst = arith.constant dense<0.000000e+00> : vector<256x128xf32>
    %11 = tpu.matmul %8, %9, %cst {dimension_numbers = #tpu.dot_dimension_numbers<[1], [0], [0], [1], [0, 0, 1, 1], [], []>} : vector<256x16xbf16>, vector<16x128xbf16>, vector<256x128xf32> -> vector<256x128xf32>
    %12 = vector.broadcast %10 : vector<1x128xf32> to vector<256x128xf32>
    %13 = arith.addf %11, %12 : vector<256x128xf32>
    %cst_9 = arith.constant 0.000000e+00 : f32
    %14 = vector.broadcast %cst_9 : f32 to vector<256x128xf32>
    %15 = arith.maximumf %13, %14 : vector<256x128xf32>
    %16 = arith.truncf %15 : vector<256x128xf32> to vector<256x128xbf16>
    %c0_10 = arith.constant 0 : index
    %c0_11 = arith.constant 0 : index
    %17 = vector.load %arg4[%c0_10, %c0_11] : memref<128x128xbf16, #tpu.memory_space<vmem>>, vector<128x128xbf16>
    %c0_12 = arith.constant 0 : index
    %c0_13 = arith.constant 0 : index
    %18 = vector.load %arg5[%c0_12, %c0_13] : memref<1x128xf32, #tpu.memory_space<vmem>>, vector<1x128xf32>
    %cst_14 = arith.constant dense<0.000000e+00> : vector<256x128xf32>
    %19 = tpu.matmul %16, %17, %cst_14 {dimension_numbers = #tpu.dot_dimension_numbers<[1], [0], [0], [1], [0, 0, 1, 1], [], []>} : vector<256x128xbf16>, vector<128x128xbf16>, vector<256x128xf32> -> vector<256x128xf32>
    %20 = vector.broadcast %18 : vector<1x128xf32> to vector<256x128xf32>
    %21 = arith.addf %19, %20 : vector<256x128xf32>
    %cst_15 = arith.constant 0.000000e+00 : f32
    %22 = vector.broadcast %cst_15 : f32 to vector<256x128xf32>
    %23 = arith.maximumf %21, %22 : vector<256x128xf32>
    %24 = arith.truncf %23 : vector<256x128xf32> to vector<256x128xbf16>
    %c0_16 = arith.constant 0 : index
    %c0_17 = arith.constant 0 : index
    %25 = vector.load %arg6[%c0_16, %c0_17] : memref<128x128xbf16, #tpu.memory_space<vmem>>, vector<128x128xbf16>
    %c0_18 = arith.constant 0 : index
    %c0_19 = arith.constant 0 : index
    %26 = vector.load %arg7[%c0_18, %c0_19] : memref<1x128xf32, #tpu.memory_space<vmem>>, vector<1x128xf32>
    %cst_20 = arith.constant dense<0.000000e+00> : vector<256x128xf32>
    %27 = tpu.matmul %24, %25, %cst_20 {dimension_numbers = #tpu.dot_dimension_numbers<[1], [0], [0], [1], [0, 0, 1, 1], [], []>} : vector<256x128xbf16>, vector<128x128xbf16>, vector<256x128xf32> -> vector<256x128xf32>
    %28 = vector.broadcast %26 : vector<1x128xf32> to vector<256x128xf32>
    %29 = arith.addf %27, %28 : vector<256x128xf32>
    %cst_21 = arith.constant 0.000000e+00 : f32
    %30 = vector.broadcast %cst_21 : f32 to vector<256x128xf32>
    %31 = arith.maximumf %29, %30 : vector<256x128xf32>
    %32 = arith.truncf %31 : vector<256x128xf32> to vector<256x128xbf16>
    %c0_22 = arith.constant 0 : index
    %c0_23 = arith.constant 0 : index
    %33 = vector.load %arg8[%c0_22, %c0_23] : memref<128x64xbf16, #tpu.memory_space<vmem>>, vector<128x64xbf16>
    %c0_24 = arith.constant 0 : index
    %c0_25 = arith.constant 0 : index
    %34 = vector.load %arg9[%c0_24, %c0_25] : memref<1x64xf32, #tpu.memory_space<vmem>>, vector<1x64xf32>
    %cst_26 = arith.constant dense<0.000000e+00> : vector<256x64xf32>
    %35 = tpu.matmul %32, %33, %cst_26 {dimension_numbers = #tpu.dot_dimension_numbers<[1], [0], [0], [1], [0, 0, 1, 1], [], []>} : vector<256x128xbf16>, vector<128x64xbf16>, vector<256x64xf32> -> vector<256x64xf32>
    %36 = vector.broadcast %34 : vector<1x64xf32> to vector<256x64xf32>
    %37 = arith.addf %35, %36 : vector<256x64xf32>
    %cst_27 = arith.constant 0.000000e+00 : f32
    %38 = vector.broadcast %cst_27 : f32 to vector<256x64xf32>
    %39 = arith.maximumf %37, %38 : vector<256x64xf32>
    %40 = arith.truncf %39 : vector<256x64xf32> to vector<256x64xbf16>
    %c0_28 = arith.constant 0 : index
    %c0_29 = arith.constant 0 : index
    %41 = vector.load %arg10[%c0_28, %c0_29] : memref<64x64xbf16, #tpu.memory_space<vmem>>, vector<64x64xbf16>
    %c0_30 = arith.constant 0 : index
    %c0_31 = arith.constant 0 : index
    %42 = vector.load %arg11[%c0_30, %c0_31] : memref<1x64xf32, #tpu.memory_space<vmem>>, vector<1x64xf32>
    %cst_32 = arith.constant dense<0.000000e+00> : vector<256x64xf32>
    %43 = tpu.matmul %40, %41, %cst_32 {dimension_numbers = #tpu.dot_dimension_numbers<[1], [0], [0], [1], [0, 0, 1, 1], [], []>} : vector<256x64xbf16>, vector<64x64xbf16>, vector<256x64xf32> -> vector<256x64xf32>
    %44 = vector.broadcast %42 : vector<1x64xf32> to vector<256x64xf32>
    %45 = arith.addf %43, %44 : vector<256x64xf32>
    %cst_33 = arith.constant 0.000000e+00 : f32
    %46 = vector.broadcast %cst_33 : f32 to vector<256x64xf32>
    %47 = arith.maximumf %45, %46 : vector<256x64xf32>
    %48 = arith.truncf %47 : vector<256x64xf32> to vector<256x64xbf16>
    %c0_34 = arith.constant 0 : index
    %c0_35 = arith.constant 0 : index
    %49 = vector.load %arg12[%c0_34, %c0_35] : memref<64x32xbf16, #tpu.memory_space<vmem>>, vector<64x32xbf16>
    %c0_36 = arith.constant 0 : index
    %c0_37 = arith.constant 0 : index
    %50 = vector.load %arg13[%c0_36, %c0_37] : memref<1x32xf32, #tpu.memory_space<vmem>>, vector<1x32xf32>
    %cst_38 = arith.constant dense<0.000000e+00> : vector<256x32xf32>
    %51 = tpu.matmul %48, %49, %cst_38 {dimension_numbers = #tpu.dot_dimension_numbers<[1], [0], [0], [1], [0, 0, 1, 1], [], []>} : vector<256x64xbf16>, vector<64x32xbf16>, vector<256x32xf32> -> vector<256x32xf32>
    %52 = vector.broadcast %50 : vector<1x32xf32> to vector<256x32xf32>
    %53 = arith.addf %51, %52 : vector<256x32xf32>
    %cst_39 = arith.constant 0.000000e+00 : f32
    %54 = vector.broadcast %cst_39 : f32 to vector<256x32xf32>
    %55 = arith.maximumf %53, %54 : vector<256x32xf32>
    %56 = arith.truncf %55 : vector<256x32xf32> to vector<256x32xbf16>
    %c0_40 = arith.constant 0 : index
    %c0_41 = arith.constant 0 : index
    %57 = vector.load %arg14[%c0_40, %c0_41] : memref<32x16xbf16, #tpu.memory_space<vmem>>, vector<32x16xbf16>
    %c0_42 = arith.constant 0 : index
    %c0_43 = arith.constant 0 : index
    %58 = vector.load %arg15[%c0_42, %c0_43] : memref<1x16xf32, #tpu.memory_space<vmem>>, vector<1x16xf32>
    %cst_44 = arith.constant dense<0.000000e+00> : vector<256x16xf32>
    %59 = tpu.matmul %56, %57, %cst_44 {dimension_numbers = #tpu.dot_dimension_numbers<[1], [0], [0], [1], [0, 0, 1, 1], [], []>} : vector<256x32xbf16>, vector<32x16xbf16>, vector<256x16xf32> -> vector<256x16xf32>
    %60 = vector.broadcast %58 : vector<1x16xf32> to vector<256x16xf32>
    %61 = arith.addf %59, %60 : vector<256x16xf32>
    %cst_45 = arith.constant 0.000000e+00 : f32
    %62 = vector.broadcast %cst_45 : f32 to vector<256x16xf32>
    %63 = arith.maximumf %61, %62 : vector<256x16xf32>
    %64 = arith.truncf %63 : vector<256x16xf32> to vector<256x16xbf16>
    %65 = arith.extf %64 : vector<256x16xbf16> to vector<256x16xf32>
    %66 = vector.broadcast %1 : vector<1x16xf32> to vector<256x16xf32>
    %67 = arith.mulf %65, %66 : vector<256x16xf32>
    %cst_46 = arith.constant dense<0.000000e+00> : vector<256xf32>
    %68 = vector.multi_reduction <add>, %67, %cst_46 [1] : vector<256x16xf32> to vector<256xf32>
    %69 = vector.shape_cast %68 : vector<256xf32> to vector<256x1xf32>
    %70 = vector.broadcast %2 : vector<1x1xf32> to vector<256x1xf32>
    %71 = arith.addf %69, %70 : vector<256x1xf32>
    %72 = arith.index_cast %6 : i32 to index
    %c0_47 = arith.constant 0 : index
    %73 = vector.load %arg18[%72, %c0_47] : memref<256x1xf32, #tpu.memory_space<vmem>>, vector<256x1xf32>
    tpu.vector_store %arg18[%72, %c0_47], %71 {strides = array<i32>} : memref<256x1xf32, #tpu.memory_space<vmem>>, vector<256x1xf32>,
    %c1_i32_48 = arith.constant 1 : i32
    return
  }
  func.func @transform_0(%arg0: i32) -> (i32, i32) {
    %c0_i32 = arith.constant 0 : i32
    %c0_i32_0 = arith.constant 0 : i32
    return %arg0, %c0_i32 : i32, i32
  }
  func.func @transform_1(%arg0: i32) -> (i32, i32) {
    %c0_i32 = arith.constant 0 : i32
    %c0_i32_0 = arith.constant 0 : i32
    %c0_i32_1 = arith.constant 0 : i32
    return %c0_i32, %c0_i32_0 : i32, i32
  }
  func.func @transform_2(%arg0: i32) -> (i32, i32) {
    %c0_i32 = arith.constant 0 : i32
    %c0_i32_0 = arith.constant 0 : i32
    %c0_i32_1 = arith.constant 0 : i32
    return %c0_i32, %c0_i32_0 : i32, i32
  }
  func.func @transform_3(%arg0: i32) -> (i32, i32) {
    %c0_i32 = arith.constant 0 : i32
    %c0_i32_0 = arith.constant 0 : i32
    %c0_i32_1 = arith.constant 0 : i32
    return %c0_i32, %c0_i32_0 : i32, i32
  }
  func.func @transform_4(%arg0: i32) -> (i32, i32) {
    %c0_i32 = arith.constant 0 : i32
    %c0_i32_0 = arith.constant 0 : i32
    %c0_i32_1 = arith.constant 0 : i32
    return %c0_i32, %c0_i32_0 : i32, i32
  }
  func.func @transform_5(%arg0: i32) -> (i32, i32) {
    %c0_i32 = arith.constant 0 : i32
    %c0_i32_0 = arith.constant 0 : i32
    %c0_i32_1 = arith.constant 0 : i32
    return %c0_i32, %c0_i32_0 : i32, i32
  }
  func.func @transform_6(%arg0: i32) -> (i32, i32) {
    %c0_i32 = arith.constant 0 : i32
    %c0_i32_0 = arith.constant 0 : i32
    %c0_i32_1 = arith.constant 0 : i32
    return %c0_i32, %c0_i32_0 : i32, i32
  }
  func.func @transform_7(%arg0: i32) -> (i32, i32) {
    %c0_i32 = arith.constant 0 : i32
    %c0_i32_0 = arith.constant 0 : i32
    %c0_i32_1 = arith.constant 0 : i32
    return %c0_i32, %c0_i32_0 : i32, i32
  }
  func.func @transform_8(%arg0: i32) -> (i32, i32) {
    %c0_i32 = arith.constant 0 : i32
    %c0_i32_0 = arith.constant 0 : i32
    %c0_i32_1 = arith.constant 0 : i32
    return %c0_i32, %c0_i32_0 : i32, i32
  }
  func.func @transform_9(%arg0: i32) -> (i32, i32) {
    %c0_i32 = arith.constant 0 : i32
    %c0_i32_0 = arith.constant 0 : i32
    %c0_i32_1 = arith.constant 0 : i32
    return %c0_i32, %c0_i32_0 : i32, i32
  }
  func.func @transform_10(%arg0: i32) -> (i32, i32) {
    %c0_i32 = arith.constant 0 : i32
    %c0_i32_0 = arith.constant 0 : i32
    %c0_i32_1 = arith.constant 0 : i32
    return %c0_i32, %c0_i32_0 : i32, i32
  }
  func.func @transform_11(%arg0: i32) -> (i32, i32) {
    %c0_i32 = arith.constant 0 : i32
    %c0_i32_0 = arith.constant 0 : i32
    %c0_i32_1 = arith.constant 0 : i32
    return %c0_i32, %c0_i32_0 : i32, i32
  }
  func.func @transform_12(%arg0: i32) -> (i32, i32) {
    %c0_i32 = arith.constant 0 : i32
    %c0_i32_0 = arith.constant 0 : i32
    %c0_i32_1 = arith.constant 0 : i32
    return %c0_i32, %c0_i32_0 : i32, i32
  }
  func.func @transform_13(%arg0: i32) -> (i32, i32) {
    %c0_i32 = arith.constant 0 : i32
    %c0_i32_0 = arith.constant 0 : i32
    %c0_i32_1 = arith.constant 0 : i32
    return %c0_i32, %c0_i32_0 : i32, i32
  }
  func.func @transform_14(%arg0: i32) -> (i32, i32) {
    %c0_i32 = arith.constant 0 : i32
    %c0_i32_0 = arith.constant 0 : i32
    %c0_i32_1 = arith.constant 0 : i32
    return %c0_i32, %c0_i32_0 : i32, i32
  }
  func.func @transform_15(%arg0: i32) -> (i32, i32) {
    %c0_i32 = arith.constant 0 : i32
    %c0_i32_0 = arith.constant 0 : i32
    %c0_i32_1 = arith.constant 0 : i32
    return %c0_i32, %c0_i32_0 : i32, i32
  }
  func.func @transform_16(%arg0: i32) -> (i32, i32) {
    %c0_i32 = arith.constant 0 : i32
    %c0_i32_0 = arith.constant 0 : i32
    %c0_i32_1 = arith.constant 0 : i32
    return %c0_i32, %c0_i32_0 : i32, i32
  }
  func.func @transform_17(%arg0: i32) -> (i32, i32) {
    %c0_i32 = arith.constant 0 : i32
    %c0_i32_0 = arith.constant 0 : i32
    return %arg0, %c0_i32 : i32, i32
  }
}

</mosaic_0001>

<bundles_post_ra>
// kernel: tpu_custom_call.1
= control target key start
LH: loop header
LB: loop body
LE: loop exit
PB: predicated region body
PF: predicated region fallthrough
CT: control target
= control target key end

     0   :  { %vm189_vm0 = vcmask 130048   ;;  %vm1326_vm1 = vcmask 523264   ;;  %vm1903_vm2 = vcmask 261120   ;;  %vm2363_vm3 = vcmask 7168   ;;  %s3823_s1 = inlined_call_operand.vmem [shape: bf16[16,128], index: 1, kind: input, shape index: {}]   ;;  %s3824_s0 = inlined_call_operand.vmem [shape: bf16[256,16], index: 0, kind: input, shape index: {}]   ;;  %s3825_s3 = inlined_call_operand.vmem [shape: bf16[128,128], index: 3, kind: input, shape index: {}]   ;;  %s3826_s5 = inlined_call_operand.vmem [shape: bf16[128,128], index: 5, kind: input, shape index: {}]   ;;  %s3827_s2 = inlined_call_operand.vmem [shape: f32[1,128], index: 2, kind: input, shape index: {}]   ;;  %s3828_s7 = inlined_call_operand.vmem [shape: bf16[128,64], index: 7, kind: input, shape index: {}]   ;;  %s3829_s4 = inlined_call_operand.vmem [shape: f32[1,128], index: 4, kind: input, shape index: {}]   ;;  %s3830_s9 = inlined_call_operand.vmem [shape: bf16[64,64], index: 9, kind: input, shape index: {}]   ;;  %s3831_s6 = inlined_call_operand.vmem [shape: f32[1,128], index: 6, kind: input, shape index: {}]   ;;  %s3832_s11 = inlined_call_operand.vmem [shape: bf16[64,32], index: 11, kind: input, shape index: {}]   ;;  %s3833_s8 = inlined_call_operand.vmem [shape: f32[1,64], index: 8, kind: input, shape index: {}]   ;;  %s3834_s13 = inlined_call_operand.vmem [shape: bf16[32,16], index: 13, kind: input, shape index: {}]   ;;  %s3835_s10 = inlined_call_operand.vmem [shape: f32[1,64], index: 10, kind: input, shape index: {}]   ;;  %s3836_s12 = inlined_call_operand.vmem [shape: f32[1,32], index: 12, kind: input, shape index: {}]   ;;  %s3837_s16 = inlined_call_operand.<no memory space> [shape: f32[1,1], index: 16, kind: input, shape index: {}]   ;;  %s3838_s14 = inlined_call_operand.vmem [shape: f32[1,16], index: 14, kind: input, shape index: {}]   ;;  %s3839_s15 = inlined_call_operand.vmem [shape: bf16[1,16], index: 15, kind: input, shape index: {}]   ;;  %s3840_s17 = inlined_call_operand.vmem [shape: f32[256,1], index: 17, kind: output, shape index: {}]  }
   0x1   :  { %3842 = sst [smem:[#allocation3_spill]] %s3823_s1  ;;  %v2983_v12 = vld [vmem:[%s3825_s3] sm:$0xff]   ;;  %v2984_v13 = vld [vmem:[%s3825_s3 + $0x8] sm:$0xff]   ;;  %v2985_v15 = vld [vmem:[%s3825_s3 + $0x10] sm:$0xff]  }
   0x2   :  { %3843 = sst [smem:[#allocation4_spill]] %s3824_s0  ;;  %s3844_s26 = sld [smem:[#allocation3_spill]]  ;;  %v2986_v19 = vld [vmem:[%s3825_s3 + $0x18] sm:$0xff]   ;;  %v2987_v20 = vld [vmem:[%s3825_s3 + $0x20] sm:$0xff]   ;;  %v2988_v22 = vld [vmem:[%s3825_s3 + $0x28] sm:$0xff]  }
   0x3   :  { %s3845_s29 = sld [smem:[#allocation4_spill]]  ;;  %v2989_v23 = vld [vmem:[%s3825_s3 + $0x30] sm:$0xff]   ;;  %v2990_v24 = vld [vmem:[%s3825_s3 + $0x38] sm:$0xff]   ;;  %v2991_v25 = vld [vmem:[%s3826_s5] sm:$0xff]  }
   0x4   :  { %v2992_v26 = vld [vmem:[%s3826_s5 + $0x8] sm:$0xff]   ;;  %v2993_v27 = vld [vmem:[%s3826_s5 + $0x10] sm:$0xff]   ;;  %v2994_v28 = vld [vmem:[%s3826_s5 + $0x18] sm:$0xff]  }
   0x5   :  { %v2995_v29 = vld [vmem:[%s3826_s5 + $0x20] sm:$0xff]   ;;  %v2996_v30 = vld [vmem:[%s3826_s5 + $0x28] sm:$0xff]  }
   0x6   :  { %v3219_v31 = vld [vmem:[%s3827_s2] ss:$0 sm:$0xff] }
   0x8   :  { %v2966_v0 = vld [vmem:[%s3844_s26] sm:$0xff]  }
   0x9   :  { %v2967_v1 = vld [vmem:[%s3845_s29] sm:$0xff]   ;;  %2670 = vmatprep.subr.bf16.mxu0 %v2966_v0  ;;  %v2968_v2 = vld [vmem:[%s3845_s29 + $0x8] sm:$0xff]   ;;  %2964 = vmatprep.subr.bf16.mxu1 %v2966_v0  ;;  %v2969_v3 = vld [vmem:[%s3845_s29 + $0x10] sm:$0xff]  }
   0xa   :  { %2671 = vmatpush3.bf16.msra.mxu0 %v2966_v0  ;;  %2672 = vmatprep.mubr.msk.bf16.mxu0 %vm189_vm0, %v2967_v1  ;;  %v2970_v4 = vld [vmem:[%s3845_s29 + $0x18] sm:$0xff]   ;;  %v2971_v5 = vld [vmem:[%s3845_s29 + $0x20] sm:$0xff]   ;;  %v2976_v7 = vld [vmem:[%s3845_s29 + $0x48] sm:$0xff]  }
   0xb   :  { %2965 = vmatpush3.bf16.msra.mxu1 %v2966_v0  ;;  %v2975_v6 = vld [vmem:[%s3845_s29 + $0x40] sm:$0xff]   ;;  %v2977_v8 = vld [vmem:[%s3845_s29 + $0x50] sm:$0xff]   ;;  %v2978_v9 = vld [vmem:[%s3845_s29 + $0x58] sm:$0xff]   ;;  %2752 = vmatprep.subr.bf16.mxu0 %v2991_v25 }
   0xc   :  { %2688 = vmatprep.mubr.msk.bf16.mxu1 %vm189_vm0, %v2975_v6  ;;  %v2972_v10 = vld [vmem:[%s3845_s29 + $0x28] sm:$0xff]   ;;  %v2979_v11 = vld [vmem:[%s3845_s29 + $0x60] sm:$0xff]   ;;  %v2973_v14 = vld [vmem:[%s3845_s29 + $0x30] sm:$0xff]   ;;  %2704 = vmatprep.subr.bf16.mxu1 %v2983_v12 }
   0xd   :  { %2673 = vmatmul.mubr.msk.bf16.vlgmr.msra.gmra.mrb[0].mxu0 %vm189_vm0, %v2968_v2  ;;  %v2980_v16 = vld [vmem:[%s3845_s29 + $0x68] sm:$0xff]   ;;  %v2981_v17 = vld [vmem:[%s3845_s29 + $0x70] sm:$0xff]   ;;  %v2974_v18 = vld [vmem:[%s3845_s29 + $0x38] sm:$0xff]  }
   0xe   :  { %2676 = vmatprep.mubr.msk.bf16.mxu0 %vm189_vm0, %v2969_v3  ;;  %2689 = vmatmul.mubr.msk.bf16.vlgmr.msra.gmra.mrb[0].mxu1 %vm189_vm0, %v2976_v7  ;;  %v2982_v21 = vld [vmem:[%s3845_s29 + $0x78] sm:$0xff]  }
   0xf   :  { %2692 = vmatprep.mubr.msk.bf16.mxu1 %vm189_vm0, %v2977_v8  ;;  %2705 = vmatpush3.bf16.msra.mxu1 %v2983_v12 }
  0x10   :  { %2706 = vmatprep.subr.bf16.mxu1 %v2984_v13  ;;  %2753 = vmatpush3.bf16.msra.mxu0 %v2991_v25 }
  0x11   :  { %2754 = vmatprep.subr.bf16.mxu0 %v2992_v26 }
  0x13   :  { %2707 = vmatpush3.bf16.msra.mxu1 %v2984_v13 }
  0x14   :  { %2708 = vmatprep.subr.bf16.mxu1 %v2985_v15  ;;  %2755 = vmatpush3.bf16.msra.mxu0 %v2992_v26 }
  0x15   :  { %2677 = vmatmul.mubr.msk.bf16.gmra.mrb[4].mxu0 %vm189_vm0, %v2970_v4  ;;  %2756 = vmatprep.subr.bf16.mxu0 %v2993_v27 }
  0x16   :  { %2680 = vmatprep.mubr.msk.bf16.mxu0 %vm189_vm0, %v2971_v5  ;;  %2693 = vmatmul.mubr.msk.bf16.gmra.mrb[4].mxu1 %vm189_vm0, %v2978_v9 }
  0x17   :  { %2696 = vmatprep.mubr.msk.bf16.mxu1 %vm189_vm0, %v2979_v11  ;;  %2709 = vmatpush3.bf16.msra.mxu1 %v2985_v15 }
  0x18   :  { %2710 = vmatprep.subr.bf16.mxu1 %v2986_v19  ;;  %2757 = vmatpush3.bf16.msra.mxu0 %v2993_v27 }
  0x19   :  { %2758 = vmatprep.subr.bf16.mxu0 %v2994_v28 }
  0x1b   :  { %2711 = vmatpush3.bf16.msra.mxu1 %v2986_v19 }
  0x1c   :  { %2712 = vmatprep.subr.bf16.mxu1 %v2987_v20  ;;  %2759 = vmatpush3.bf16.msra.mxu0 %v2994_v28 }
  0x1d   :  { %2681 = vmatmul.mubr.msk.bf16.gmra.mrb[8].mxu0 %vm189_vm0, %v2972_v10  ;;  %2760 = vmatprep.subr.bf16.mxu0 %v2995_v29 }
  0x1e   :  { %2684 = vmatprep.mubr.msk.bf16.mxu0 %vm189_vm0, %v2973_v14  ;;  %2697 = vmatmul.mubr.msk.bf16.gmra.mrb[8].mxu1 %vm189_vm0, %v2980_v16 }
  0x1f   :  { %2700 = vmatprep.mubr.msk.bf16.mxu1 %vm189_vm0, %v2981_v17  ;;  %2713 = vmatpush3.bf16.msra.mxu1 %v2987_v20 }
  0x20   :  { %2714 = vmatprep.subr.bf16.mxu1 %v2988_v22  ;;  %2761 = vmatpush3.bf16.msra.mxu0 %v2995_v29 }
  0x21   :  { %2762 = vmatprep.subr.bf16.mxu0 %v2996_v30 }
  0x23   :  { %2715 = vmatpush3.bf16.msra.mxu1 %v2988_v22 }
  0x24   :  { %2716 = vmatprep.subr.bf16.mxu1 %v2989_v23  ;;  %2763 = vmatpush3.bf16.msra.mxu0 %v2996_v30 }
  0x25   :  { %2685 = vmatmul.mubr.msk.bf16.gmra.mrb[12].mxu0 %vm189_vm0, %v2974_v18 }
  0x26   :  { %2701 = vmatmul.mubr.msk.bf16.gmra.mrb[12].mxu1 %vm189_vm0, %v2982_v21 }
  0x27   :  { %2717 = vmatpush3.bf16.msra.mxu1 %v2989_v23 }
  0x28   :  { %2718 = vmatprep.subr.bf16.mxu1 %v2990_v24 }
  0x2b   :  { %2719 = vmatpush3.bf16.msra.mxu1 %v2990_v24 }
  0xe0   :  { %v2674_v32 = vpop.f32.mrb[0].mxu0 }
  0xe1   :  { %v281_v33 = vadd.f32 %v2674_v32, %v3219_v31  ;;  %v272_v34 = vpop.f32.mrb[1].mxu0  ;;  %v2690_v44 = vpop.f32.mrb[0].mxu1 }
  0xe2   :  { %v273_v35 = vadd.f32 %v3219_v31, %v272_v34  ;;  %v2675_v36 = vpop.f32.mrb[2].mxu0  ;;  %v345_v46 = vadd.f32 %v2690_v44, %v3219_v31  ;;  %v336_v47 = vpop.f32.mrb[1].mxu1 }
  0xe3   :  { %v284_v37 = vadd.f32 %v2675_v36, %v3219_v31  ;;  %v275_v38 = vpop.f32.mrb[3].mxu0  ;;  %v401_v40 = vmax.f32 %v281_v33, 0.0  ;;  %v337_v50 = vadd.f32 %v3219_v31, %v336_v47  ;;  %v2691_v51 = vpop.f32.mrb[2].mxu1 }
  0xe4   :  { %v276_v39 = vadd.f32 %v3219_v31, %v275_v38  ;;  %v399_v42 = vmax.f32 %v273_v35, 0.0  ;;  %v417_v54 = vmax.f32 %v345_v46, 0.0  ;;  %v348_v55 = vadd.f32 %v2691_v51, %v3219_v31  ;;  %v339_v56 = vpop.f32.mrb[3].mxu1 }
  0xe5   :  { %v402_v41 = vmax.f32 %v284_v37, 0.0  ;;  %v415_v59 = vmax.f32 %v337_v50, 0.0  ;;  %v340_v60 = vadd.f32 %v3219_v31, %v339_v56 }
  0xe6   :  { %v400_v43 = vmax.f32 %v276_v39, 0.0  ;;  %v418_v63 = vmax.f32 %v348_v55, 0.0 }
  0xe7   :  { %v432_v45 = vpack.c.bf16 %v402_v41, %v401_v40  ;;  %v416_v1 = vmax.f32 %v340_v60, 0.0 }
  0xe8   :  { %v431_v48 = vpack.c.bf16 %v400_v43, %v399_v42  ;;  %v2678_v49 = vpop.f32.mrb[4].mxu0  ;;  %v3233_v4 = vpack.c.bf16 %v418_v63, %v417_v54 }
  0xe9   :  { %v297_v52 = vadd.f32 %v2678_v49, %v3219_v31  ;;  %v288_v53 = vpop.f32.mrb[5].mxu0  ;;  %v3235_v7 = vpack.c.bf16 %v416_v1, %v415_v59  ;;  %v2694_v8 = vpop.f32.mrb[4].mxu1 }
  0xea   :  { %v289_v57 = vadd.f32 %v3219_v31, %v288_v53  ;;  %v2679_v58 = vpop.f32.mrb[6].mxu0  ;;  %2720 = vmatprep.mubr.bf16.mxu1 %v431_v48  ;;  %v361_v10 = vadd.f32 %v2694_v8, %v3219_v31  ;;  %v352_v11 = vpop.f32.mrb[5].mxu1 }
  0xeb   :  { %v300_v61 = vadd.f32 %v2679_v58, %v3219_v31  ;;  %v291_v62 = vpop.f32.mrb[7].mxu0  ;;  %2721 = vmatmul.mubr.bf16.vlgmr.msra.gmra.mrb[16].mxu1 %v432_v45  ;;  %v405_v2 = vmax.f32 %v297_v52, 0.0  ;;  %v353_v14 = vadd.f32 %v3219_v31, %v352_v11  ;;  %v2695_v15 = vpop.f32.mrb[6].mxu1 }
  0xec   :  { %v292_v0 = vadd.f32 %v3219_v31, %v291_v62  ;;  %v403_v5 = vmax.f32 %v289_v57, 0.0  ;;  %v421_v18 = vmax.f32 %v361_v10, 0.0  ;;  %v364_v19 = vadd.f32 %v2695_v15, %v3219_v31  ;;  %v355_v20 = vpop.f32.mrb[7].mxu1 }
  0xed   :  { %v406_v3 = vmax.f32 %v300_v61, 0.0  ;;  %v419_v23 = vmax.f32 %v353_v14, 0.0  ;;  %v356_v24 = vadd.f32 %v3219_v31, %v355_v20  ;;  %v3001_v20 = vld [vmem:[%s3828_s7 + $0x10] sm:$0xff]  }
  0xee   :  { %v404_v6 = vmax.f32 %v292_v0, 0.0  ;;  %v422_v27 = vmax.f32 %v364_v19, 0.0  ;;  %v2997_v19 = vld [vmem:[%s3826_s5 + $0x30] sm:$0xff]  }
  0xef   :  { %v434_v9 = vpack.c.bf16 %v406_v3, %v405_v2  ;;  %v420_v29 = vmax.f32 %v356_v24, 0.0  ;;  %2764 = vmatprep.subr.bf16.mxu0 %v2997_v19  ;;  %v3005_v24 = vld [vmem:[%s3828_s7 + $0x30] sm:$0xff]  }
  0xf0   :  { %v433_v12 = vpack.c.bf16 %v404_v6, %v403_v5  ;;  %v2682_v13 = vpop.f32.mrb[8].mxu0  ;;  %v442_v33 = vpack.c.bf16 %v422_v27, %v421_v18  ;;  %2765 = vmatpush3.bf16.msra.mxu0 %v2997_v19 }
  0xf1   :  { %v313_v16 = vadd.f32 %v2682_v13, %v3219_v31  ;;  %v304_v17 = vpop.f32.mrb[9].mxu0  ;;  %v441_v36 = vpack.c.bf16 %v420_v29, %v419_v23  ;;  %v2698_v37 = vpop.f32.mrb[8].mxu1  ;;  %v3004_v23 = vld [vmem:[%s3828_s7 + $0x28] sm:$0xff]  }
  0xf2   :  { %v305_v21 = vadd.f32 %v3219_v31, %v304_v17  ;;  %v2683_v22 = vpop.f32.mrb[10].mxu0  ;;  %2724 = vmatprep.mubr.bf16.mxu1 %v433_v12  ;;  %v377_v39 = vadd.f32 %v2698_v37, %v3219_v31  ;;  %v368_v40 = vpop.f32.mrb[9].mxu1 }
  0xf3   :  { %v316_v25 = vadd.f32 %v2683_v22, %v3219_v31  ;;  %v307_v26 = vpop.f32.mrb[11].mxu0  ;;  %2725 = vmatmul.mubr.bf16.gmra.mrb[20].mxu1 %v434_v9  ;;  %v409_v30 = vmax.f32 %v313_v16, 0.0  ;;  %v369_v43 = vadd.f32 %v3219_v31, %v368_v40  ;;  %v2699_v44 = vpop.f32.mrb[10].mxu1  ;;  %v3003_v22 = vld [vmem:[%s3828_s7 + $0x20] sm:$0xff]  }
  0xf4   :  { %v308_v28 = vadd.f32 %v3219_v31, %v307_v26  ;;  %v407_v34 = vmax.f32 %v305_v21, 0.0  ;;  %v425_v47 = vmax.f32 %v377_v39, 0.0  ;;  %v380_v48 = vadd.f32 %v2699_v44, %v3219_v31  ;;  %v371_v49 = vpop.f32.mrb[11].mxu1  ;;  %v3002_v21 = vld [vmem:[%s3828_s7 + $0x18] sm:$0xff]  }
  0xf5   :  { %v410_v32 = vmax.f32 %v316_v25, 0.0  ;;  %v423_v52 = vmax.f32 %v369_v43, 0.0  ;;  %v372_v53 = vadd.f32 %v3219_v31, %v371_v49  ;;  %v3289_v25 = vld [vmem:[%s3829_s4] ss:$0 sm:$0xff] }
  0xf6   :  { %v408_v35 = vmax.f32 %v308_v28, 0.0  ;;  %v426_v56 = vmax.f32 %v380_v48, 0.0 }
  0xf7   :  { %v436_v38 = vpack.c.bf16 %v410_v32, %v409_v30  ;;  %v424_v58 = vmax.f32 %v372_v53, 0.0 }
  0xf8   :  { %v435_v41 = vpack.c.bf16 %v408_v35, %v407_v34  ;;  %v2686_v42 = vpop.f32.mrb[12].mxu0  ;;  %v444_v61 = vpack.c.bf16 %v426_v56, %v425_v47 }
  0xf9   :  { %v329_v45 = vadd.f32 %v2686_v42, %v3219_v31  ;;  %v320_v46 = vpop.f32.mrb[13].mxu0  ;;  %v443_v0 = vpack.c.bf16 %v424_v58, %v423_v52  ;;  %v2702_v1 = vpop.f32.mrb[12].mxu1 }
  0xfa   :  { %v321_v50 = vadd.f32 %v3219_v31, %v320_v46  ;;  %v2687_v51 = vpop.f32.mrb[14].mxu0  ;;  %2728 = vmatprep.mubr.bf16.mxu1 %v435_v41  ;;  %v393_v3 = vadd.f32 %v2702_v1, %v3219_v31  ;;  %v384_v5 = vpop.f32.mrb[13].mxu1 }
  0xfb   :  { %v332_v54 = vadd.f32 %v2687_v51, %v3219_v31  ;;  %v323_v55 = vpop.f32.mrb[15].mxu0  ;;  %2729 = vmatmul.mubr.bf16.gmra.mrb[24].mxu1 %v436_v38  ;;  %v413_v59 = vmax.f32 %v329_v45, 0.0  ;;  %v385_v8 = vadd.f32 %v3219_v31, %v384_v5  ;;  %v2703_v9 = vpop.f32.mrb[14].mxu1 }
  0xfc   :  { %v324_v57 = vadd.f32 %v3219_v31, %v323_v55  ;;  %v411_v62 = vmax.f32 %v321_v50, 0.0  ;;  %v429_v10 = vmax.f32 %v393_v3, 0.0  ;;  %v396_v11 = vadd.f32 %v2703_v9, %v3219_v31  ;;  %v387_v12 = vpop.f32.mrb[15].mxu1 }
  0xfd   :  { %v414_v60 = vmax.f32 %v332_v54, 0.0  ;;  %v427_v13 = vmax.f32 %v385_v8, 0.0  ;;  %v388_v14 = vadd.f32 %v3219_v31, %v387_v12  ;;  %v2998_v31 = vld [vmem:[%s3826_s5 + $0x38] sm:$0xff]  }
  0xfe   :  { %v412_v63 = vmax.f32 %v324_v57, 0.0  ;;  %v430_v15 = vmax.f32 %v396_v11, 0.0  ;;  %2766 = vmatprep.subr.bf16.mxu0 %v2998_v31 }
  0xff   :  { %v438_v2 = vpack.c.bf16 %v414_v60, %v413_v59  ;;  %v428_v16 = vmax.f32 %v388_v14, 0.0  ;;  %2767 = vmatpush3.bf16.msra.mxu0 %v2998_v31 }
 0x100   :  { %v437_v6 = vpack.c.bf16 %v412_v63, %v411_v62  ;;  %v446_v17 = vpack.c.bf16 %v430_v15, %v429_v10 }
 0x101   :  { %v445_v18 = vpack.c.bf16 %v428_v16, %v427_v13 }
 0x102   :  { %2732 = vmatprep.mubr.bf16.mxu1 %v437_v6 }
 0x103   :  { %2733 = vmatmul.mubr.bf16.gmra.mrb[28].mxu1 %v438_v2 }
 0x104   :  { %2736 = vmatprep.mubr.bf16.mxu1 %v3235_v7  ;;  %v3000_v7 = vld [vmem:[%s3828_s7 + $0x8] sm:$0xff]  }
 0x10b   :  { %2737 = vmatmul.mubr.bf16.gmra.mrb[32].mxu1 %v3233_v4  ;;  %v2999_v4 = vld [vmem:[%s3828_s7] sm:$0xff]  }
 0x10c   :  { %2740 = vmatprep.mubr.bf16.mxu1 %v441_v36  ;;  %2800 = vmatprep.subr.bf16.mxu1 %v2999_v4 }
 0x10d   :  { %2801 = vmatpush3.bf16.msra.mxu1 %v2999_v4 }
 0x10e   :  { %2802 = vmatprep.subr.bf16.mxu1 %v3000_v7 }
 0x111   :  { %2803 = vmatpush3.bf16.msra.mxu1 %v3000_v7 }
 0x112   :  { %2804 = vmatprep.subr.bf16.mxu1 %v3001_v20 }
 0x113   :  { %2741 = vmatmul.mubr.bf16.gmra.mrb[36].mxu1 %v442_v33 }
 0x114   :  { %2744 = vmatprep.mubr.bf16.mxu1 %v443_v0 }
 0x115   :  { %2805 = vmatpush3.bf16.msra.mxu1 %v3001_v20 }
 0x116   :  { %2806 = vmatprep.subr.bf16.mxu1 %v3002_v21 }
 0x119   :  { %2807 = vmatpush3.bf16.msra.mxu1 %v3002_v21 }
 0x11a   :  { %2808 = vmatprep.subr.bf16.mxu1 %v3003_v22 }
 0x11b   :  { %2745 = vmatmul.mubr.bf16.gmra.mrb[40].mxu1 %v444_v61 }
 0x11c   :  { %2748 = vmatprep.mubr.bf16.mxu1 %v445_v18 }
 0x11d   :  { %2809 = vmatpush3.bf16.msra.mxu1 %v3003_v22 }
 0x11e   :  { %2810 = vmatprep.subr.bf16.mxu1 %v3004_v23 }
 0x121   :  { %2811 = vmatpush3.bf16.msra.mxu1 %v3004_v23 }
 0x122   :  { %2812 = vmatprep.subr.bf16.mxu1 %v3005_v24 }
 0x123   :  { %2749 = vmatmul.mubr.bf16.gmra.mrb[44].mxu1 %v446_v17 }
 0x125   :  { %2813 = vmatpush3.bf16.msra.mxu1 %v3005_v24 }
 0x1be   :  { %v2722_v26 = vpop.f32.mrb[16].mxu1 }
 0x1bf   :  { %v561_v27 = vadd.f32 %v2722_v26, %v3289_v25  ;;  %v552_v28 = vpop.f32.mrb[17].mxu1 }
 0x1c0   :  { %v553_v29 = vadd.f32 %v3289_v25, %v552_v28  ;;  %v2723_v30 = vpop.f32.mrb[18].mxu1 }
 0x1c1   :  { %v564_v32 = vadd.f32 %v2723_v30, %v3289_v25  ;;  %v555_v33 = vpop.f32.mrb[19].mxu1  ;;  %v681_v35 = vmax.f32 %v561_v27, 0.0 }
 0x1c2   :  { %v556_v34 = vadd.f32 %v3289_v25, %v555_v33  ;;  %v679_v37 = vmax.f32 %v553_v29, 0.0 }
 0x1c3   :  { %v682_v36 = vmax.f32 %v564_v32, 0.0 }
 0x1c4   :  { %v680_v38 = vmax.f32 %v556_v34, 0.0 }
 0x1c5   :  { %v712_v39 = vpack.c.bf16 %v682_v36, %v681_v35 }
 0x1c6   :  { %v711_v40 = vpack.c.bf16 %v680_v38, %v679_v37  ;;  %v2726_v41 = vpop.f32.mrb[20].mxu1 }
 0x1c7   :  { %v577_v42 = vadd.f32 %v2726_v41, %v3289_v25  ;;  %v568_v43 = vpop.f32.mrb[21].mxu1 }
 0x1c8   :  { %v569_v44 = vadd.f32 %v3289_v25, %v568_v43  ;;  %v2727_v45 = vpop.f32.mrb[22].mxu1  ;;  %2768 = vmatprep.mubr.bf16.mxu0 %v711_v40 }
 0x1c9   :  { %v580_v46 = vadd.f32 %v2727_v45, %v3289_v25  ;;  %v571_v47 = vpop.f32.mrb[23].mxu1  ;;  %2769 = vmatmul.mubr.bf16.vlgmr.msra.gmra.mrb[16].mxu0 %v712_v39  ;;  %v685_v49 = vmax.f32 %v577_v42, 0.0 }
 0x1ca   :  { %v572_v48 = vadd.f32 %v3289_v25, %v571_v47  ;;  %v683_v51 = vmax.f32 %v569_v44, 0.0 }
 0x1cb   :  { %v686_v50 = vmax.f32 %v580_v46, 0.0 }
 0x1cc   :  { %v684_v52 = vmax.f32 %v572_v48, 0.0 }
 0x1cd   :  { %v714_v53 = vpack.c.bf16 %v686_v50, %v685_v49 }
 0x1ce   :  { %v713_v54 = vpack.c.bf16 %v684_v52, %v683_v51  ;;  %v2730_v55 = vpop.f32.mrb[24].mxu1 }
 0x1cf   :  { %v593_v56 = vadd.f32 %v2730_v55, %v3289_v25  ;;  %v584_v57 = vpop.f32.mrb[25].mxu1 }
 0x1d0   :  { %v585_v58 = vadd.f32 %v3289_v25, %v584_v57  ;;  %v2731_v59 = vpop.f32.mrb[26].mxu1  ;;  %2772 = vmatprep.mubr.bf16.mxu0 %v713_v54 }
 0x1d1   :  { %v596_v60 = vadd.f32 %v2731_v59, %v3289_v25  ;;  %v587_v61 = vpop.f32.mrb[27].mxu1  ;;  %2773 = vmatmul.mubr.bf16.gmra.mrb[20].mxu0 %v714_v53  ;;  %v689_v63 = vmax.f32 %v593_v56, 0.0 }
 0x1d2   :  { %v588_v62 = vadd.f32 %v3289_v25, %v587_v61  ;;  %v687_v1 = vmax.f32 %v585_v58, 0.0 }
 0x1d3   :  { %v690_v0 = vmax.f32 %v596_v60, 0.0 }
 0x1d4   :  { %v688_v2 = vmax.f32 %v588_v62, 0.0 }
 0x1d5   :  { %v716_v3 = vpack.c.bf16 %v690_v0, %v689_v63 }
 0x1d6   :  { %v715_v5 = vpack.c.bf16 %v688_v2, %v687_v1  ;;  %v2734_v6 = vpop.f32.mrb[28].mxu1 }
 0x1d7   :  { %v609_v8 = vadd.f32 %v2734_v6, %v3289_v25  ;;  %v600_v9 = vpop.f32.mrb[29].mxu1 }
 0x1d8   :  { %v601_v10 = vadd.f32 %v3289_v25, %v600_v9  ;;  %v2735_v11 = vpop.f32.mrb[30].mxu1  ;;  %2776 = vmatprep.mubr.bf16.mxu0 %v715_v5 }
 0x1d9   :  { %v612_v12 = vadd.f32 %v2735_v11, %v3289_v25  ;;  %v603_v13 = vpop.f32.mrb[31].mxu1  ;;  %2777 = vmatmul.mubr.bf16.gmra.mrb[24].mxu0 %v716_v3  ;;  %v693_v15 = vmax.f32 %v609_v8, 0.0 }
 0x1da   :  { %v604_v14 = vadd.f32 %v3289_v25, %v603_v13  ;;  %v691_v17 = vmax.f32 %v601_v10, 0.0 }
 0x1db   :  { %v694_v16 = vmax.f32 %v612_v12, 0.0 }
 0x1dc   :  { %v692_v18 = vmax.f32 %v604_v14, 0.0  ;;  %v3006_v14 = vld [vmem:[%s3828_s7 + $0x38] sm:$0xff]  }
 0x1dd   :  { %v718_v19 = vpack.c.bf16 %v694_v16, %v693_v15  ;;  %2814 = vmatprep.subr.bf16.mxu1 %v3006_v14  ;;  %v3007_v15 = vld [vmem:[%s3830_s9] sm:$0xff]   ;;  %v3009_v16 = vld [vmem:[%s3830_s9 + $0x10] sm:$0xff]  }
 0x1de   :  { %v717_v31 = vpack.c.bf16 %v692_v18, %v691_v17  ;;  %v2738_v4 = vpop.f32.mrb[32].mxu1  ;;  %2815 = vmatpush3.bf16.msra.mxu1 %v3006_v14  ;;  %2848 = vmatprep.subr.bf16.mxu0 %v3007_v15  ;;  %v3010_v17 = vld [vmem:[%s3830_s9 + $0x18] sm:$0xff]   ;;  %v3341_v18 = vld [vmem:[%s3831_s6] ss:$0 sm:$0xff] }
 0x1df   :  { %v625_v7 = vadd.f32 %v2738_v4, %v3289_v25  ;;  %v616_v20 = vpop.f32.mrb[33].mxu1  ;;  %2849 = vmatpush3.bf16.msra.mxu0 %v3007_v15 }
 0x1e0   :  { %v617_v21 = vadd.f32 %v3289_v25, %v616_v20  ;;  %v2739_v22 = vpop.f32.mrb[34].mxu1  ;;  %2780 = vmatprep.mubr.bf16.mxu0 %v717_v31 }
 0x1e1   :  { %v628_v23 = vadd.f32 %v2739_v22, %v3289_v25  ;;  %v619_v24 = vpop.f32.mrb[35].mxu1  ;;  %2781 = vmatmul.mubr.bf16.gmra.mrb[28].mxu0 %v718_v19  ;;  %v697_v27 = vmax.f32 %v625_v7, 0.0 }
 0x1e2   :  { %v620_v26 = vadd.f32 %v3289_v25, %v619_v24  ;;  %v695_v29 = vmax.f32 %v617_v21, 0.0 }
 0x1e3   :  { %v698_v28 = vmax.f32 %v628_v23, 0.0 }
 0x1e4   :  { %v696_v30 = vmax.f32 %v620_v26, 0.0 }
 0x1e5   :  { %v720_v32 = vpack.c.bf16 %v698_v28, %v697_v27 }
 0x1e6   :  { %v719_v33 = vpack.c.bf16 %v696_v30, %v695_v29  ;;  %v2742_v34 = vpop.f32.mrb[36].mxu1 }
 0x1e7   :  { %v641_v35 = vadd.f32 %v2742_v34, %v3289_v25  ;;  %v632_v36 = vpop.f32.mrb[37].mxu1 }
 0x1e8   :  { %v633_v37 = vadd.f32 %v3289_v25, %v632_v36  ;;  %v2743_v38 = vpop.f32.mrb[38].mxu1  ;;  %2784 = vmatprep.mubr.bf16.mxu0 %v719_v33 }
 0x1e9   :  { %v644_v39 = vadd.f32 %v2743_v38, %v3289_v25  ;;  %v635_v40 = vpop.f32.mrb[39].mxu1  ;;  %2785 = vmatmul.mubr.bf16.gmra.mrb[32].mxu0 %v720_v32  ;;  %v701_v42 = vmax.f32 %v641_v35, 0.0 }
 0x1ea   :  { %v636_v41 = vadd.f32 %v3289_v25, %v635_v40  ;;  %v699_v44 = vmax.f32 %v633_v37, 0.0 }
 0x1eb   :  { %v702_v43 = vmax.f32 %v644_v39, 0.0 }
 0x1ec   :  { %v700_v45 = vmax.f32 %v636_v41, 0.0 }
 0x1ed   :  { %v722_v46 = vpack.c.bf16 %v702_v43, %v701_v42 }
 0x1ee   :  { %v721_v47 = vpack.c.bf16 %v700_v45, %v699_v44  ;;  %v2746_v48 = vpop.f32.mrb[40].mxu1 }
 0x1ef   :  { %v657_v49 = vadd.f32 %v2746_v48, %v3289_v25  ;;  %v648_v50 = vpop.f32.mrb[41].mxu1 }
 0x1f0   :  { %v649_v51 = vadd.f32 %v3289_v25, %v648_v50  ;;  %v2747_v52 = vpop.f32.mrb[42].mxu1  ;;  %2788 = vmatprep.mubr.bf16.mxu0 %v721_v47 }
 0x1f1   :  { %v660_v53 = vadd.f32 %v2747_v52, %v3289_v25  ;;  %v651_v54 = vpop.f32.mrb[43].mxu1  ;;  %2789 = vmatmul.mubr.bf16.gmra.mrb[36].mxu0 %v722_v46  ;;  %v705_v56 = vmax.f32 %v657_v49, 0.0 }
 0x1f2   :  { %v652_v55 = vadd.f32 %v3289_v25, %v651_v54  ;;  %v703_v58 = vmax.f32 %v649_v51, 0.0 }
 0x1f3   :  { %v706_v57 = vmax.f32 %v660_v53, 0.0 }
 0x1f4   :  { %v704_v59 = vmax.f32 %v652_v55, 0.0 }
 0x1f5   :  { %v724_v60 = vpack.c.bf16 %v706_v57, %v705_v56 }
 0x1f6   :  { %v723_v61 = vpack.c.bf16 %v704_v59, %v703_v58  ;;  %v2750_v62 = vpop.f32.mrb[44].mxu1 }
 0x1f7   :  { %v673_v63 = vadd.f32 %v2750_v62, %v3289_v25  ;;  %v664_v0 = vpop.f32.mrb[45].mxu1 }
 0x1f8   :  { %v665_v1 = vadd.f32 %v3289_v25, %v664_v0  ;;  %v2751_v2 = vpop.f32.mrb[46].mxu1  ;;  %2792 = vmatprep.mubr.bf16.mxu0 %v723_v61 }
 0x1f9   :  { %v676_v3 = vadd.f32 %v2751_v2, %v3289_v25  ;;  %v667_v5 = vpop.f32.mrb[47].mxu1  ;;  %2793 = vmatmul.mubr.bf16.gmra.mrb[40].mxu0 %v724_v60  ;;  %v709_v8 = vmax.f32 %v673_v63, 0.0 }
 0x1fa   :  { %v668_v6 = vadd.f32 %v3289_v25, %v667_v5  ;;  %v707_v10 = vmax.f32 %v665_v1, 0.0  ;;  %v3008_v25 = vld [vmem:[%s3830_s9 + $0x8] sm:$0xff]  }
 0x1fb   :  { %v710_v9 = vmax.f32 %v676_v3, 0.0  ;;  %2850 = vmatprep.subr.bf16.mxu0 %v3008_v25 }
 0x1fc   :  { %v708_v11 = vmax.f32 %v668_v6, 0.0  ;;  %2851 = vmatpush3.bf16.msra.mxu0 %v3008_v25 }
 0x1fd   :  { %v726_v12 = vpack.c.bf16 %v710_v9, %v709_v8  ;;  %2852 = vmatprep.subr.bf16.mxu0 %v3009_v16 }
 0x1fe   :  { %v725_v13 = vpack.c.bf16 %v708_v11, %v707_v10 }
 0x200   :  { %2796 = vmatprep.mubr.bf16.mxu0 %v725_v13  ;;  %2853 = vmatpush3.bf16.msra.mxu0 %v3009_v16 }
 0x201   :  { %2797 = vmatmul.mubr.bf16.gmra.mrb[44].mxu0 %v726_v12  ;;  %2854 = vmatprep.subr.bf16.mxu0 %v3010_v17 }
 0x204   :  { %2855 = vmatpush3.bf16.msra.mxu0 %v3010_v17 }
 0x29c   :  { %v2770_v19 = vpop.f32.mrb[16].mxu0 }
 0x29d   :  { %v841_v31 = vadd.f32 %v2770_v19, %v3341_v18  ;;  %v832_v4 = vpop.f32.mrb[17].mxu0 }
 0x29e   :  { %v833_v7 = vadd.f32 %v3341_v18, %v832_v4  ;;  %v2771_v20 = vpop.f32.mrb[18].mxu0 }
 0x29f   :  { %v844_v21 = vadd.f32 %v2771_v20, %v3341_v18  ;;  %v835_v22 = vpop.f32.mrb[19].mxu0  ;;  %v961_v24 = vmax.f32 %v841_v31, 0.0 }
 0x2a0   :  { %v836_v23 = vadd.f32 %v3341_v18, %v835_v22  ;;  %v959_v27 = vmax.f32 %v833_v7, 0.0 }
 0x2a1   :  { %v962_v26 = vmax.f32 %v844_v21, 0.0 }
 0x2a2   :  { %v960_v28 = vmax.f32 %v836_v23, 0.0 }
 0x2a3   :  { %v992_v29 = vpack.c.bf16 %v962_v26, %v961_v24 }
 0x2a4   :  { %v991_v30 = vpack.c.bf16 %v960_v28, %v959_v27  ;;  %v2774_v32 = vpop.f32.mrb[20].mxu0 }
 0x2a5   :  { %v857_v33 = vadd.f32 %v2774_v32, %v3341_v18  ;;  %v848_v34 = vpop.f32.mrb[21].mxu0 }
 0x2a6   :  { %v849_v35 = vadd.f32 %v3341_v18, %v848_v34  ;;  %v2775_v36 = vpop.f32.mrb[22].mxu0  ;;  %2816 = vmatprep.mubr.bf16.mxu1 %v991_v30 }
 0x2a7   :  { %v860_v37 = vadd.f32 %v2775_v36, %v3341_v18  ;;  %v851_v38 = vpop.f32.mrb[23].mxu0  ;;  %2817 = vmatmul.mubr.bf16.vlgmr.msra.gmra.mrb[48].mxu1 %v992_v29  ;;  %v965_v40 = vmax.f32 %v857_v33, 0.0 }
 0x2a8   :  { %v852_v39 = vadd.f32 %v3341_v18, %v851_v38  ;;  %v963_v42 = vmax.f32 %v849_v35, 0.0 }
 0x2a9   :  { %v966_v41 = vmax.f32 %v860_v37, 0.0 }
 0x2aa   :  { %v964_v43 = vmax.f32 %v852_v39, 0.0 }
 0x2ab   :  { %v994_v44 = vpack.c.bf16 %v966_v41, %v965_v40 }
 0x2ac   :  { %v993_v45 = vpack.c.bf16 %v964_v43, %v963_v42  ;;  %v2778_v46 = vpop.f32.mrb[24].mxu0 }
 0x2ad   :  { %v873_v47 = vadd.f32 %v2778_v46, %v3341_v18  ;;  %v864_v48 = vpop.f32.mrb[25].mxu0 }
 0x2ae   :  { %v865_v49 = vadd.f32 %v3341_v18, %v864_v48  ;;  %v2779_v50 = vpop.f32.mrb[26].mxu0  ;;  %2820 = vmatprep.mubr.bf16.mxu1 %v993_v45 }
 0x2af   :  { %v876_v51 = vadd.f32 %v2779_v50, %v3341_v18  ;;  %v867_v52 = vpop.f32.mrb[27].mxu0  ;;  %2821 = vmatmul.mubr.bf16.gmra.mrb[52].mxu1 %v994_v44  ;;  %v969_v54 = vmax.f32 %v873_v47, 0.0 }
 0x2b0   :  { %v868_v53 = vadd.f32 %v3341_v18, %v867_v52  ;;  %v967_v56 = vmax.f32 %v865_v49, 0.0 }
 0x2b1   :  { %v970_v55 = vmax.f32 %v876_v51, 0.0 }
 0x2b2   :  { %v968_v57 = vmax.f32 %v868_v53, 0.0 }
 0x2b3   :  { %v996_v58 = vpack.c.bf16 %v970_v55, %v969_v54 }
 0x2b4   :  { %v995_v59 = vpack.c.bf16 %v968_v57, %v967_v56  ;;  %v2782_v60 = vpop.f32.mrb[28].mxu0 }
 0x2b5   :  { %v889_v61 = vadd.f32 %v2782_v60, %v3341_v18  ;;  %v880_v62 = vpop.f32.mrb[29].mxu0 }
 0x2b6   :  { %v881_v63 = vadd.f32 %v3341_v18, %v880_v62  ;;  %v2783_v0 = vpop.f32.mrb[30].mxu0  ;;  %2824 = vmatprep.mubr.bf16.mxu1 %v995_v59 }
 0x2b7   :  { %v892_v1 = vadd.f32 %v2783_v0, %v3341_v18  ;;  %v883_v2 = vpop.f32.mrb[31].mxu0  ;;  %2825 = vmatmul.mubr.bf16.gmra.mrb[56].mxu1 %v996_v58  ;;  %v973_v5 = vmax.f32 %v889_v61, 0.0 }
 0x2b8   :  { %v884_v3 = vadd.f32 %v3341_v18, %v883_v2  ;;  %v971_v8 = vmax.f32 %v881_v63, 0.0 }
 0x2b9   :  { %v974_v6 = vmax.f32 %v892_v1, 0.0 }
 0x2ba   :  { %v972_v9 = vmax.f32 %v884_v3, 0.0  ;;  %v3011_v3 = vld [vmem:[%s3832_s11] sm:$0xff]  }
 0x2bb   :  { %v998_v10 = vpack.c.bf16 %v974_v6, %v973_v5  ;;  %v3012_v5 = vld [vmem:[%s3832_s11 + $0x8] sm:$0xff]   ;;  %2888 = vmatprep.subr.bf16.mxu1 %v3011_v3  ;;  %v3014_v6 = vld [vmem:[%s3832_s11 + $0x18] sm:$0xff]  }
 0x2bc   :  { %v997_v11 = vpack.c.bf16 %v972_v9, %v971_v8  ;;  %v2786_v12 = vpop.f32.mrb[32].mxu0  ;;  %2889 = vmatpush3.bf16.msra.mxu1 %v3011_v3  ;;  %v3390_v8 = vld [vmem:[%s3833_s8] ss:$0 sm:$0xff] }
 0x2bd   :  { %v905_v13 = vadd.f32 %v2786_v12, %v3341_v18  ;;  %v896_v14 = vpop.f32.mrb[33].mxu0  ;;  %2890 = vmatprep.subr.bf16.mxu1 %v3012_v5 }
 0x2be   :  { %v897_v15 = vadd.f32 %v3341_v18, %v896_v14  ;;  %v2787_v25 = vpop.f32.mrb[34].mxu0  ;;  %2828 = vmatprep.mubr.bf16.mxu1 %v997_v11 }
 0x2bf   :  { %v908_v16 = vadd.f32 %v2787_v25, %v3341_v18  ;;  %v899_v17 = vpop.f32.mrb[35].mxu0  ;;  %2829 = vmatmul.mubr.bf16.gmra.mrb[60].mxu1 %v998_v10  ;;  %v977_v31 = vmax.f32 %v905_v13, 0.0 }
 0x2c0   :  { %v900_v19 = vadd.f32 %v3341_v18, %v899_v17  ;;  %v975_v7 = vmax.f32 %v897_v15, 0.0  ;;  %2891 = vmatpush3.bf16.msra.mxu1 %v3012_v5 }
 0x2c1   :  { %v978_v4 = vmax.f32 %v908_v16, 0.0 }
 0x2c2   :  { %v976_v20 = vmax.f32 %v900_v19, 0.0 }
 0x2c3   :  { %v1000_v21 = vpack.c.bf16 %v978_v4, %v977_v31 }
 0x2c4   :  { %v999_v22 = vpack.c.bf16 %v976_v20, %v975_v7  ;;  %v2790_v23 = vpop.f32.mrb[36].mxu0 }
 0x2c5   :  { %v921_v24 = vadd.f32 %v2790_v23, %v3341_v18  ;;  %v912_v26 = vpop.f32.mrb[37].mxu0 }
 0x2c6   :  { %v913_v27 = vadd.f32 %v3341_v18, %v912_v26  ;;  %v2791_v28 = vpop.f32.mrb[38].mxu0  ;;  %2832 = vmatprep.mubr.bf16.mxu1 %v999_v22 }
 0x2c7   :  { %v924_v29 = vadd.f32 %v2791_v28, %v3341_v18  ;;  %v915_v30 = vpop.f32.mrb[39].mxu0  ;;  %2833 = vmatmul.mubr.bf16.gmra.mrb[64].mxu1 %v1000_v21  ;;  %v981_v33 = vmax.f32 %v921_v24, 0.0 }
 0x2c8   :  { %v916_v32 = vadd.f32 %v3341_v18, %v915_v30  ;;  %v979_v35 = vmax.f32 %v913_v27, 0.0 }
 0x2c9   :  { %v982_v34 = vmax.f32 %v924_v29, 0.0 }
 0x2ca   :  { %v980_v36 = vmax.f32 %v916_v32, 0.0 }
 0x2cb   :  { %v1002_v37 = vpack.c.bf16 %v982_v34, %v981_v33 }
 0x2cc   :  { %v1001_v38 = vpack.c.bf16 %v980_v36, %v979_v35  ;;  %v2794_v39 = vpop.f32.mrb[40].mxu0 }
 0x2cd   :  { %v937_v40 = vadd.f32 %v2794_v39, %v3341_v18  ;;  %v928_v41 = vpop.f32.mrb[41].mxu0 }
 0x2ce   :  { %v929_v42 = vadd.f32 %v3341_v18, %v928_v41  ;;  %v2795_v43 = vpop.f32.mrb[42].mxu0  ;;  %2836 = vmatprep.mubr.bf16.mxu1 %v1001_v38 }
 0x2cf   :  { %v940_v44 = vadd.f32 %v2795_v43, %v3341_v18  ;;  %v931_v45 = vpop.f32.mrb[43].mxu0  ;;  %2837 = vmatmul.mubr.bf16.gmra.mrb[68].mxu1 %v1002_v37  ;;  %v985_v47 = vmax.f32 %v937_v40, 0.0 }
 0x2d0   :  { %v932_v46 = vadd.f32 %v3341_v18, %v931_v45  ;;  %v983_v49 = vmax.f32 %v929_v42, 0.0 }
 0x2d1   :  { %v986_v48 = vmax.f32 %v940_v44, 0.0 }
 0x2d2   :  { %v984_v50 = vmax.f32 %v932_v46, 0.0 }
 0x2d3   :  { %v1004_v51 = vpack.c.bf16 %v986_v48, %v985_v47 }
 0x2d4   :  { %v1003_v52 = vpack.c.bf16 %v984_v50, %v983_v49  ;;  %v2798_v53 = vpop.f32.mrb[44].mxu0 }
 0x2d5   :  { %v953_v54 = vadd.f32 %v2798_v53, %v3341_v18  ;;  %v944_v55 = vpop.f32.mrb[45].mxu0 }
 0x2d6   :  { %v945_v56 = vadd.f32 %v3341_v18, %v944_v55  ;;  %v2799_v57 = vpop.f32.mrb[46].mxu0  ;;  %2840 = vmatprep.mubr.bf16.mxu1 %v1003_v52 }
 0x2d7   :  { %v956_v58 = vadd.f32 %v2799_v57, %v3341_v18  ;;  %v947_v59 = vpop.f32.mrb[47].mxu0  ;;  %2841 = vmatmul.mubr.bf16.gmra.mrb[72].mxu1 %v1004_v51  ;;  %v989_v61 = vmax.f32 %v953_v54, 0.0 }
 0x2d8   :  { %v948_v60 = vadd.f32 %v3341_v18, %v947_v59  ;;  %v987_v63 = vmax.f32 %v945_v56, 0.0  ;;  %v3013_v18 = vld [vmem:[%s3832_s11 + $0x10] sm:$0xff]  }
 0x2d9   :  { %v990_v62 = vmax.f32 %v956_v58, 0.0  ;;  %2892 = vmatprep.subr.bf16.mxu1 %v3013_v18 }
 0x2da   :  { %v988_v0 = vmax.f32 %v948_v60, 0.0  ;;  %2893 = vmatpush3.bf16.msra.mxu1 %v3013_v18 }
 0x2db   :  { %v1006_v1 = vpack.c.bf16 %v990_v62, %v989_v61  ;;  %2894 = vmatprep.subr.bf16.mxu1 %v3014_v6 }
 0x2dc   :  { %v1005_v2 = vpack.c.bf16 %v988_v0, %v987_v63 }
 0x2de   :  { %2844 = vmatprep.mubr.bf16.mxu1 %v1005_v2  ;;  %2895 = vmatpush3.bf16.msra.mxu1 %v3014_v6 }
 0x2df   :  { %2845 = vmatmul.mubr.bf16.gmra.mrb[76].mxu1 %v1006_v1 }
 0x37a   :  { %v2818_v9 = vpop.f32.mrb[48].mxu1 }
 0x37b   :  { %v1121_v10 = vadd.f32 %v2818_v9, %v3390_v8  ;;  %v1112_v11 = vpop.f32.mrb[49].mxu1 }
 0x37c   :  { %v1113_v12 = vadd.f32 %v3390_v8, %v1112_v11  ;;  %v2819_v13 = vpop.f32.mrb[50].mxu1 }
 0x37d   :  { %v1124_v14 = vadd.f32 %v2819_v13, %v3390_v8  ;;  %v1115_v15 = vpop.f32.mrb[51].mxu1  ;;  %v1241_v16 = vmax.f32 %v1121_v10, 0.0 }
 0x37e   :  { %v1116_v25 = vadd.f32 %v3390_v8, %v1115_v15  ;;  %v1239_v19 = vmax.f32 %v1113_v12, 0.0 }
 0x37f   :  { %v1242_v17 = vmax.f32 %v1124_v14, 0.0 }
 0x380   :  { %v1240_v31 = vmax.f32 %v1116_v25, 0.0 }
 0x381   :  { %v1272_v4 = vpack.c.bf16 %v1242_v17, %v1241_v16 }
 0x382   :  { %v1271_v7 = vpack.c.bf16 %v1240_v31, %v1239_v19  ;;  %v2822_v20 = vpop.f32.mrb[52].mxu1 }
 0x383   :  { %v1137_v21 = vadd.f32 %v2822_v20, %v3390_v8  ;;  %v1128_v22 = vpop.f32.mrb[53].mxu1 }
 0x384   :  { %v1129_v23 = vadd.f32 %v3390_v8, %v1128_v22  ;;  %v2823_v24 = vpop.f32.mrb[54].mxu1  ;;  %2856 = vmatprep.mubr.msk.bf16.mxu0 %vm1326_vm1, %v1271_v7 }
 0x385   :  { %v1140_v26 = vadd.f32 %v2823_v24, %v3390_v8  ;;  %v1131_v27 = vpop.f32.mrb[55].mxu1  ;;  %2857 = vmatmul.mubr.msk.bf16.vlgmr.msra.gmra.mrb[48].mxu0 %vm1326_vm1, %v1272_v4  ;;  %v1245_v29 = vmax.f32 %v1137_v21, 0.0 }
 0x386   :  { %v1132_v28 = vadd.f32 %v3390_v8, %v1131_v27  ;;  %v1243_v32 = vmax.f32 %v1129_v23, 0.0 }
 0x387   :  { %v1246_v30 = vmax.f32 %v1140_v26, 0.0 }
 0x388   :  { %v1244_v33 = vmax.f32 %v1132_v28, 0.0 }
 0x389   :  { %v1274_v34 = vpack.c.bf16 %v1246_v30, %v1245_v29 }
 0x38a   :  { %v1273_v35 = vpack.c.bf16 %v1244_v33, %v1243_v32  ;;  %v2826_v36 = vpop.f32.mrb[56].mxu1 }
 0x38b   :  { %v1153_v37 = vadd.f32 %v2826_v36, %v3390_v8  ;;  %v1144_v38 = vpop.f32.mrb[57].mxu1 }
 0x38c   :  { %v1145_v39 = vadd.f32 %v3390_v8, %v1144_v38  ;;  %v2827_v40 = vpop.f32.mrb[58].mxu1  ;;  %2860 = vmatprep.mubr.msk.bf16.mxu0 %vm1326_vm1, %v1273_v35 }
 0x38d   :  { %v1156_v41 = vadd.f32 %v2827_v40, %v3390_v8  ;;  %v1147_v42 = vpop.f32.mrb[59].mxu1  ;;  %2861 = vmatmul.mubr.msk.bf16.gmra.mrb[52].mxu0 %vm1326_vm1, %v1274_v34  ;;  %v1249_v44 = vmax.f32 %v1153_v37, 0.0 }
 0x38e   :  { %v1148_v43 = vadd.f32 %v3390_v8, %v1147_v42  ;;  %v1247_v46 = vmax.f32 %v1145_v39, 0.0 }
 0x38f   :  { %v1250_v45 = vmax.f32 %v1156_v41, 0.0 }
 0x390   :  { %v1248_v47 = vmax.f32 %v1148_v43, 0.0 }
 0x391   :  { %v1276_v48 = vpack.c.bf16 %v1250_v45, %v1249_v44 }
 0x392   :  { %v1275_v49 = vpack.c.bf16 %v1248_v47, %v1247_v46  ;;  %v2830_v50 = vpop.f32.mrb[60].mxu1 }
 0x393   :  { %v1169_v51 = vadd.f32 %v2830_v50, %v3390_v8  ;;  %v1160_v52 = vpop.f32.mrb[61].mxu1 }
 0x394   :  { %v1161_v53 = vadd.f32 %v3390_v8, %v1160_v52  ;;  %v2831_v54 = vpop.f32.mrb[62].mxu1  ;;  %2864 = vmatprep.mubr.msk.bf16.mxu0 %vm1326_vm1, %v1275_v49 }
 0x395   :  { %v1172_v55 = vadd.f32 %v2831_v54, %v3390_v8  ;;  %v1163_v56 = vpop.f32.mrb[63].mxu1  ;;  %2865 = vmatmul.mubr.msk.bf16.gmra.mrb[56].mxu0 %vm1326_vm1, %v1276_v48  ;;  %v1253_v58 = vmax.f32 %v1169_v51, 0.0 }
 0x396   :  { %v1164_v57 = vadd.f32 %v3390_v8, %v1163_v56  ;;  %v1251_v60 = vmax.f32 %v1161_v53, 0.0 }
 0x397   :  { %v1254_v59 = vmax.f32 %v1172_v55, 0.0 }
 0x398   :  { %v1252_v61 = vmax.f32 %v1164_v57, 0.0  ;;  %v3015_v57 = vld [vmem:[%s3834_s13] sm:$0xff]  }
 0x399   :  { %v1278_v62 = vpack.c.bf16 %v1254_v59, %v1253_v58  ;;  %v3016_v58 = vld [vmem:[%s3834_s13 + $0x8] sm:$0xff]   ;;  %2928 = vmatprep.subr.bf16.mxu0 %v3015_v57 }
 0x39a   :  { %v1277_v63 = vpack.c.bf16 %v1252_v61, %v1251_v60  ;;  %v2834_v0 = vpop.f32.mrb[64].mxu1  ;;  %2929 = vmatpush3.bf16.msra.mxu0 %v3015_v57 }
 0x39b   :  { %v1185_v1 = vadd.f32 %v2834_v0, %v3390_v8  ;;  %v1176_v2 = vpop.f32.mrb[65].mxu1  ;;  %2930 = vmatprep.subr.bf16.mxu0 %v3016_v58 }
 0x39c   :  { %v1177_v3 = vadd.f32 %v3390_v8, %v1176_v2  ;;  %v2835_v5 = vpop.f32.mrb[66].mxu1  ;;  %2868 = vmatprep.mubr.msk.bf16.mxu0 %vm1326_vm1, %v1277_v63 }
 0x39d   :  { %v1188_v18 = vadd.f32 %v2835_v5, %v3390_v8  ;;  %v1179_v6 = vpop.f32.mrb[67].mxu1  ;;  %2869 = vmatmul.mubr.msk.bf16.gmra.mrb[60].mxu0 %vm1326_vm1, %v1278_v62  ;;  %v1257_v10 = vmax.f32 %v1185_v1, 0.0 }
 0x39e   :  { %v1180_v9 = vadd.f32 %v3390_v8, %v1179_v6  ;;  %v1255_v12 = vmax.f32 %v1177_v3, 0.0  ;;  %2931 = vmatpush3.bf16.msra.mxu0 %v3016_v58 }
 0x39f   :  { %v1258_v11 = vmax.f32 %v1188_v18, 0.0 }
 0x3a0   :  { %v1256_v13 = vmax.f32 %v1180_v9, 0.0 }
 0x3a1   :  { %v1280_v14 = vpack.c.bf16 %v1258_v11, %v1257_v10 }
 0x3a2   :  { %v1279_v15 = vpack.c.bf16 %v1256_v13, %v1255_v12  ;;  %v2838_v25 = vpop.f32.mrb[68].mxu1 }
 0x3a3   :  { %v1201_v16 = vadd.f32 %v2838_v25, %v3390_v8  ;;  %v1192_v17 = vpop.f32.mrb[69].mxu1 }
 0x3a4   :  { %v1193_v19 = vadd.f32 %v3390_v8, %v1192_v17  ;;  %v2839_v31 = vpop.f32.mrb[70].mxu1  ;;  %2872 = vmatprep.mubr.msk.bf16.mxu0 %vm1326_vm1, %v1279_v15 }
 0x3a5   :  { %v1204_v4 = vadd.f32 %v2839_v31, %v3390_v8  ;;  %v1195_v7 = vpop.f32.mrb[71].mxu1  ;;  %2873 = vmatmul.mubr.msk.bf16.gmra.mrb[64].mxu0 %vm1326_vm1, %v1280_v14  ;;  %v1261_v21 = vmax.f32 %v1201_v16, 0.0 }
 0x3a6   :  { %v1196_v20 = vadd.f32 %v3390_v8, %v1195_v7  ;;  %v1259_v23 = vmax.f32 %v1193_v19, 0.0 }
 0x3a7   :  { %v1262_v22 = vmax.f32 %v1204_v4, 0.0 }
 0x3a8   :  { %v1260_v24 = vmax.f32 %v1196_v20, 0.0 }
 0x3a9   :  { %v1282_v26 = vpack.c.bf16 %v1262_v22, %v1261_v21 }
 0x3aa   :  { %v1281_v27 = vpack.c.bf16 %v1260_v24, %v1259_v23  ;;  %v2842_v28 = vpop.f32.mrb[72].mxu1 }
 0x3ab   :  { %v1217_v29 = vadd.f32 %v2842_v28, %v3390_v8  ;;  %v1208_v30 = vpop.f32.mrb[73].mxu1 }
 0x3ac   :  { %v1209_v32 = vadd.f32 %v3390_v8, %v1208_v30  ;;  %v2843_v33 = vpop.f32.mrb[74].mxu1  ;;  %2876 = vmatprep.mubr.msk.bf16.mxu0 %vm1326_vm1, %v1281_v27 }
 0x3ad   :  { %v1220_v34 = vadd.f32 %v2843_v33, %v3390_v8  ;;  %v1211_v35 = vpop.f32.mrb[75].mxu1  ;;  %2877 = vmatmul.mubr.msk.bf16.gmra.mrb[68].mxu0 %vm1326_vm1, %v1282_v26  ;;  %v1265_v37 = vmax.f32 %v1217_v29, 0.0 }
 0x3ae   :  { %v1212_v36 = vadd.f32 %v3390_v8, %v1211_v35  ;;  %v1263_v39 = vmax.f32 %v1209_v32, 0.0 }
 0x3af   :  { %v1266_v38 = vmax.f32 %v1220_v34, 0.0 }
 0x3b0   :  { %v1264_v40 = vmax.f32 %v1212_v36, 0.0 }
 0x3b1   :  { %v1284_v41 = vpack.c.bf16 %v1266_v38, %v1265_v37 }
 0x3b2   :  { %v1283_v42 = vpack.c.bf16 %v1264_v40, %v1263_v39  ;;  %v2846_v43 = vpop.f32.mrb[76].mxu1 }
 0x3b3   :  { %v1233_v44 = vadd.f32 %v2846_v43, %v3390_v8  ;;  %v1224_v45 = vpop.f32.mrb[77].mxu1 }
 0x3b4   :  { %v1225_v46 = vadd.f32 %v3390_v8, %v1224_v45  ;;  %v2847_v47 = vpop.f32.mrb[78].mxu1  ;;  %2880 = vmatprep.mubr.msk.bf16.mxu0 %vm1326_vm1, %v1283_v42 }
 0x3b5   :  { %v1236_v48 = vadd.f32 %v2847_v47, %v3390_v8  ;;  %v1227_v49 = vpop.f32.mrb[79].mxu1  ;;  %2881 = vmatmul.mubr.msk.bf16.gmra.mrb[72].mxu0 %vm1326_vm1, %v1284_v41  ;;  %v1269_v51 = vmax.f32 %v1233_v44, 0.0 }
 0x3b6   :  { %v1228_v50 = vadd.f32 %v3390_v8, %v1227_v49  ;;  %v1267_v53 = vmax.f32 %v1225_v46, 0.0  ;;  %v3449_v8 = vld [vmem:[%s3835_s10] ss:$0 sm:$0xff] }
 0x3b7   :  { %v1270_v52 = vmax.f32 %v1236_v48, 0.0 }
 0x3b8   :  { %v1268_v54 = vmax.f32 %v1228_v50, 0.0 }
 0x3b9   :  { %v1286_v55 = vpack.c.bf16 %v1270_v52, %v1269_v51 }
 0x3ba   :  { %v1285_v56 = vpack.c.bf16 %v1268_v54, %v1267_v53 }
 0x3bc   :  { %2884 = vmatprep.mubr.msk.bf16.mxu0 %vm1326_vm1, %v1285_v56 }
 0x3bd   :  { %2885 = vmatmul.mubr.msk.bf16.gmra.mrb[76].mxu0 %vm1326_vm1, %v1286_v55 }
 0x458   :  { %v2858_v59 = vpop.f32.mrb[48].mxu0 }
 0x459   :  { %v1418_v60 = vadd.f32 %v2858_v59, %v3449_v8  ;;  %v1409_v61 = vpop.f32.mrb[49].mxu0 }
 0x45a   :  { %v1410_v62 = vadd.f32 %v3449_v8, %v1409_v61  ;;  %v2859_v63 = vpop.f32.mrb[50].mxu0 }
 0x45b   :  { %v1421_v0 = vadd.f32 %v2859_v63, %v3449_v8  ;;  %v1412_v1 = vpop.f32.mrb[51].mxu0  ;;  %v1538_v3 = vmax.f32 %v1418_v60, 0.0 }
 0x45c   :  { %v1413_v2 = vadd.f32 %v3449_v8, %v1412_v1  ;;  %v1536_v18 = vmax.f32 %v1410_v62, 0.0 }
 0x45d   :  { %v1539_v5 = vmax.f32 %v1421_v0, 0.0 }
 0x45e   :  { %v1537_v6 = vmax.f32 %v1413_v2, 0.0 }
 0x45f   :  { %v1569_v9 = vpack.c.bf16 %v1539_v5, %v1538_v3 }
 0x460   :  { %v1568_v10 = vpack.c.bf16 %v1537_v6, %v1536_v18  ;;  %v2862_v11 = vpop.f32.mrb[52].mxu0 }
 0x461   :  { %v1434_v12 = vadd.f32 %v2862_v11, %v3449_v8  ;;  %v1425_v13 = vpop.f32.mrb[53].mxu0 }
 0x462   :  { %v1426_v14 = vadd.f32 %v3449_v8, %v1425_v13  ;;  %v2863_v15 = vpop.f32.mrb[54].mxu0  ;;  %2896 = vmatprep.mubr.msk.bf16.mxu1 %vm1326_vm1, %v1568_v10 }
 0x463   :  { %v1437_v25 = vadd.f32 %v2863_v15, %v3449_v8  ;;  %v1428_v16 = vpop.f32.mrb[55].mxu0  ;;  %2897 = vmatmul.mubr.msk.bf16.vlgmr.msra.gmra.mrb[80].mxu1 %vm1326_vm1, %v1569_v9  ;;  %v1542_v19 = vmax.f32 %v1434_v12, 0.0 }
 0x464   :  { %v1429_v17 = vadd.f32 %v3449_v8, %v1428_v16  ;;  %v1540_v4 = vmax.f32 %v1426_v14, 0.0 }
 0x465   :  { %v1543_v31 = vmax.f32 %v1437_v25, 0.0 }
 0x466   :  { %v1541_v7 = vmax.f32 %v1429_v17, 0.0 }
 0x467   :  { %v1571_v20 = vpack.c.bf16 %v1543_v31, %v1542_v19 }
 0x468   :  { %v1570_v21 = vpack.c.bf16 %v1541_v7, %v1540_v4  ;;  %v2866_v22 = vpop.f32.mrb[56].mxu0 }
 0x469   :  { %v1450_v23 = vadd.f32 %v2866_v22, %v3449_v8  ;;  %v1441_v24 = vpop.f32.mrb[57].mxu0 }
 0x46a   :  { %v1442_v26 = vadd.f32 %v3449_v8, %v1441_v24  ;;  %v2867_v27 = vpop.f32.mrb[58].mxu0  ;;  %2900 = vmatprep.mubr.msk.bf16.mxu1 %vm1326_vm1, %v1570_v21 }
 0x46b   :  { %v1453_v28 = vadd.f32 %v2867_v27, %v3449_v8  ;;  %v1444_v29 = vpop.f32.mrb[59].mxu0  ;;  %2901 = vmatmul.mubr.msk.bf16.gmra.mrb[84].mxu1 %vm1326_vm1, %v1571_v20  ;;  %v1546_v32 = vmax.f32 %v1450_v23, 0.0 }
 0x46c   :  { %v1445_v30 = vadd.f32 %v3449_v8, %v1444_v29  ;;  %v1544_v34 = vmax.f32 %v1442_v26, 0.0 }
 0x46d   :  { %v1547_v33 = vmax.f32 %v1453_v28, 0.0 }
 0x46e   :  { %v1545_v35 = vmax.f32 %v1445_v30, 0.0 }
 0x46f   :  { %v1573_v36 = vpack.c.bf16 %v1547_v33, %v1546_v32 }
 0x470   :  { %v1572_v37 = vpack.c.bf16 %v1545_v35, %v1544_v34  ;;  %v2870_v38 = vpop.f32.mrb[60].mxu0 }
 0x471   :  { %v1466_v39 = vadd.f32 %v2870_v38, %v3449_v8  ;;  %v1457_v40 = vpop.f32.mrb[61].mxu0 }
 0x472   :  { %v1458_v41 = vadd.f32 %v3449_v8, %v1457_v40  ;;  %v2871_v42 = vpop.f32.mrb[62].mxu0  ;;  %2904 = vmatprep.mubr.msk.bf16.mxu1 %vm1326_vm1, %v1572_v37 }
 0x473   :  { %v1469_v43 = vadd.f32 %v2871_v42, %v3449_v8  ;;  %v1460_v44 = vpop.f32.mrb[63].mxu0  ;;  %2905 = vmatmul.mubr.msk.bf16.gmra.mrb[88].mxu1 %vm1326_vm1, %v1573_v36  ;;  %v1550_v46 = vmax.f32 %v1466_v39, 0.0 }
 0x474   :  { %v1461_v45 = vadd.f32 %v3449_v8, %v1460_v44  ;;  %v1548_v48 = vmax.f32 %v1458_v41, 0.0 }
 0x475   :  { %v1551_v47 = vmax.f32 %v1469_v43, 0.0 }
 0x476   :  { %v1549_v49 = vmax.f32 %v1461_v45, 0.0  ;;  %v3502_v45 = vld [vmem:[%s3836_s12] ss:$0 sm:$0xff] }
 0x477   :  { %v1575_v50 = vpack.c.bf16 %v1551_v47, %v1550_v46 }
 0x478   :  { %v1574_v51 = vpack.c.bf16 %v1549_v49, %v1548_v48  ;;  %v2874_v52 = vpop.f32.mrb[64].mxu0 }
 0x479   :  { %v1482_v53 = vadd.f32 %v2874_v52, %v3449_v8  ;;  %v1473_v54 = vpop.f32.mrb[65].mxu0 }
 0x47a   :  { %v1474_v55 = vadd.f32 %v3449_v8, %v1473_v54  ;;  %v2875_v56 = vpop.f32.mrb[66].mxu0  ;;  %2908 = vmatprep.mubr.msk.bf16.mxu1 %vm1326_vm1, %v1574_v51 }
 0x47b   :  { %v1485_v57 = vadd.f32 %v2875_v56, %v3449_v8  ;;  %v1476_v58 = vpop.f32.mrb[67].mxu0  ;;  %2909 = vmatmul.mubr.msk.bf16.gmra.mrb[92].mxu1 %vm1326_vm1, %v1575_v50  ;;  %v1554_v60 = vmax.f32 %v1482_v53, 0.0 }
 0x47c   :  { %v1477_v59 = vadd.f32 %v3449_v8, %v1476_v58  ;;  %v1552_v62 = vmax.f32 %v1474_v55, 0.0 }
 0x47d   :  { %v1555_v61 = vmax.f32 %v1485_v57, 0.0 }
 0x47e   :  { %v1553_v63 = vmax.f32 %v1477_v59, 0.0 }
 0x47f   :  { %v1577_v0 = vpack.c.bf16 %v1555_v61, %v1554_v60 }
 0x480   :  { %v1576_v1 = vpack.c.bf16 %v1553_v63, %v1552_v62  ;;  %v2878_v2 = vpop.f32.mrb[68].mxu0 }
 0x481   :  { %v1498_v3 = vadd.f32 %v2878_v2, %v3449_v8  ;;  %v1489_v5 = vpop.f32.mrb[69].mxu0 }
 0x482   :  { %v1490_v18 = vadd.f32 %v3449_v8, %v1489_v5  ;;  %v2879_v6 = vpop.f32.mrb[70].mxu0  ;;  %2912 = vmatprep.mubr.msk.bf16.mxu1 %vm1326_vm1, %v1576_v1 }
 0x483   :  { %v1501_v9 = vadd.f32 %v2879_v6, %v3449_v8  ;;  %v1492_v10 = vpop.f32.mrb[71].mxu0  ;;  %2913 = vmatmul.mubr.msk.bf16.gmra.mrb[96].mxu1 %vm1326_vm1, %v1577_v0  ;;  %v1558_v12 = vmax.f32 %v1498_v3, 0.0 }
 0x484   :  { %v1493_v11 = vadd.f32 %v3449_v8, %v1492_v10  ;;  %v1556_v14 = vmax.f32 %v1490_v18, 0.0 }
 0x485   :  { %v1559_v13 = vmax.f32 %v1501_v9, 0.0 }
 0x486   :  { %v1557_v15 = vmax.f32 %v1493_v11, 0.0 }
 0x487   :  { %v1579_v25 = vpack.c.bf16 %v1559_v13, %v1558_v12 }
 0x488   :  { %v1578_v16 = vpack.c.bf16 %v1557_v15, %v1556_v14  ;;  %v2882_v17 = vpop.f32.mrb[72].mxu0 }
 0x489   :  { %v1514_v19 = vadd.f32 %v2882_v17, %v3449_v8  ;;  %v1505_v31 = vpop.f32.mrb[73].mxu0 }
 0x48a   :  { %v1506_v4 = vadd.f32 %v3449_v8, %v1505_v31  ;;  %v2883_v7 = vpop.f32.mrb[74].mxu0  ;;  %2916 = vmatprep.mubr.msk.bf16.mxu1 %vm1326_vm1, %v1578_v16 }
 0x48b   :  { %v1517_v20 = vadd.f32 %v2883_v7, %v3449_v8  ;;  %v1508_v21 = vpop.f32.mrb[75].mxu0  ;;  %2917 = vmatmul.mubr.msk.bf16.gmra.mrb[100].mxu1 %vm1326_vm1, %v1579_v25  ;;  %v1562_v23 = vmax.f32 %v1514_v19, 0.0 }
 0x48c   :  { %v1509_v22 = vadd.f32 %v3449_v8, %v1508_v21  ;;  %v1560_v26 = vmax.f32 %v1506_v4, 0.0 }
 0x48d   :  { %v1563_v24 = vmax.f32 %v1517_v20, 0.0 }
 0x48e   :  { %v1561_v27 = vmax.f32 %v1509_v22, 0.0 }
 0x48f   :  { %v1581_v28 = vpack.c.bf16 %v1563_v24, %v1562_v23 }
 0x490   :  { %v1580_v29 = vpack.c.bf16 %v1561_v27, %v1560_v26  ;;  %v2886_v30 = vpop.f32.mrb[76].mxu0 }
 0x491   :  { %v1530_v32 = vadd.f32 %v2886_v30, %v3449_v8  ;;  %v1521_v33 = vpop.f32.mrb[77].mxu0 }
 0x492   :  { %v1522_v34 = vadd.f32 %v3449_v8, %v1521_v33  ;;  %v2887_v35 = vpop.f32.mrb[78].mxu0  ;;  %2920 = vmatprep.mubr.msk.bf16.mxu1 %vm1326_vm1, %v1580_v29 }
 0x493   :  { %v1533_v36 = vadd.f32 %v2887_v35, %v3449_v8  ;;  %v1524_v37 = vpop.f32.mrb[79].mxu0  ;;  %2921 = vmatmul.mubr.msk.bf16.gmra.mrb[104].mxu1 %vm1326_vm1, %v1581_v28  ;;  %v1566_v39 = vmax.f32 %v1530_v32, 0.0 }
 0x494   :  { %v1525_v38 = vadd.f32 %v3449_v8, %v1524_v37  ;;  %v1564_v41 = vmax.f32 %v1522_v34, 0.0 }
 0x495   :  { %v1567_v40 = vmax.f32 %v1533_v36, 0.0 }
 0x496   :  { %v1565_v42 = vmax.f32 %v1525_v38, 0.0 }
 0x497   :  { %v1583_v43 = vpack.c.bf16 %v1567_v40, %v1566_v39 }
 0x498   :  { %v1582_v44 = vpack.c.bf16 %v1565_v42, %v1564_v41 }
 0x49a   :  { %2924 = vmatprep.mubr.msk.bf16.mxu1 %vm1326_vm1, %v1582_v44 }
 0x49b   :  { %2925 = vmatmul.mubr.msk.bf16.gmra.mrb[108].mxu1 %vm1326_vm1, %v1583_v43 }
 0x536   :  { %v2898_v46 = vpop.f32.mrb[80].mxu1 }
 0x537   :  { %v1714_v47 = vadd.f32 %v2898_v46, %v3502_v45  ;;  %v1705_v48 = vpop.f32.mrb[81].mxu1 }
 0x538   :  { %v1706_v8 = vadd.f32 %v3502_v45, %v1705_v48  ;;  %v2899_v49 = vpop.f32.mrb[82].mxu1 }
 0x539   :  { %v1717_v50 = vadd.f32 %v2899_v49, %v3502_v45  ;;  %v1708_v51 = vpop.f32.mrb[83].mxu1  ;;  %v1834_v53 = vmax.f32 %v1714_v47, 0.0 }
 0x53a   :  { %v1709_v52 = vadd.f32 %v3502_v45, %v1708_v51  ;;  %v1832_v55 = vmax.f32 %v1706_v8, 0.0 }
 0x53b   :  { %v1835_v54 = vmax.f32 %v1717_v50, 0.0 }
 0x53c   :  { %v1833_v56 = vmax.f32 %v1709_v52, 0.0 }
 0x53d   :  { %v1865_v57 = vpack.c.bf16 %v1835_v54, %v1834_v53 }
 0x53e   :  { %v1864_v58 = vpack.c.bf16 %v1833_v56, %v1832_v55  ;;  %v2902_v59 = vpop.f32.mrb[84].mxu1 }
 0x53f   :  { %v1730_v60 = vadd.f32 %v2902_v59, %v3502_v45  ;;  %v1721_v61 = vpop.f32.mrb[85].mxu1 }
 0x540   :  { %v1722_v62 = vadd.f32 %v3502_v45, %v1721_v61  ;;  %v2903_v63 = vpop.f32.mrb[86].mxu1  ;;  %2932 = vmatprep.mubr.msk.bf16.mxu0 %vm1903_vm2, %v1864_v58 }
 0x541   :  { %v1733_v0 = vadd.f32 %v2903_v63, %v3502_v45  ;;  %v1724_v1 = vpop.f32.mrb[87].mxu1  ;;  %2933 = vmatmul.mubr.msk.bf16.vlgmr.msra.gmra.mrb[80].mxu0 %vm1903_vm2, %v1865_v57  ;;  %v1838_v3 = vmax.f32 %v1730_v60, 0.0 }
 0x542   :  { %v1725_v2 = vadd.f32 %v3502_v45, %v1724_v1  ;;  %v1836_v18 = vmax.f32 %v1722_v62, 0.0 }
 0x543   :  { %v1839_v5 = vmax.f32 %v1733_v0, 0.0 }
 0x544   :  { %v1837_v6 = vmax.f32 %v1725_v2, 0.0 }
 0x545   :  { %v1867_v9 = vpack.c.bf16 %v1839_v5, %v1838_v3 }
 0x546   :  { %v1866_v10 = vpack.c.bf16 %v1837_v6, %v1836_v18  ;;  %v2906_v11 = vpop.f32.mrb[88].mxu1 }
 0x547   :  { %v1746_v12 = vadd.f32 %v2906_v11, %v3502_v45  ;;  %v1737_v13 = vpop.f32.mrb[89].mxu1 }
 0x548   :  { %v1738_v14 = vadd.f32 %v3502_v45, %v1737_v13  ;;  %v2907_v15 = vpop.f32.mrb[90].mxu1  ;;  %2936 = vmatprep.mubr.msk.bf16.mxu0 %vm1903_vm2, %v1866_v10 }
 0x549   :  { %v1749_v25 = vadd.f32 %v2907_v15, %v3502_v45  ;;  %v1740_v16 = vpop.f32.mrb[91].mxu1  ;;  %2937 = vmatmul.mubr.msk.bf16.gmra.mrb[84].mxu0 %vm1903_vm2, %v1867_v9  ;;  %v1842_v19 = vmax.f32 %v1746_v12, 0.0 }
 0x54a   :  { %v1741_v17 = vadd.f32 %v3502_v45, %v1740_v16  ;;  %v1840_v4 = vmax.f32 %v1738_v14, 0.0 }
 0x54b   :  { %v1843_v31 = vmax.f32 %v1749_v25, 0.0 }
 0x54c   :  { %v1841_v7 = vmax.f32 %v1741_v17, 0.0 }
 0x54d   :  { %v1869_v20 = vpack.c.bf16 %v1843_v31, %v1842_v19 }
 0x54e   :  { %v1868_v21 = vpack.c.bf16 %v1841_v7, %v1840_v4  ;;  %v2910_v22 = vpop.f32.mrb[92].mxu1 }
 0x54f   :  { %v1762_v23 = vadd.f32 %v2910_v22, %v3502_v45  ;;  %v1753_v24 = vpop.f32.mrb[93].mxu1 }
 0x550   :  { %v1754_v26 = vadd.f32 %v3502_v45, %v1753_v24  ;;  %v2911_v27 = vpop.f32.mrb[94].mxu1  ;;  %2940 = vmatprep.mubr.msk.bf16.mxu0 %vm1903_vm2, %v1868_v21 }
 0x551   :  { %v1765_v28 = vadd.f32 %v2911_v27, %v3502_v45  ;;  %v1756_v29 = vpop.f32.mrb[95].mxu1  ;;  %2941 = vmatmul.mubr.msk.bf16.gmra.mrb[88].mxu0 %vm1903_vm2, %v1869_v20  ;;  %v1846_v32 = vmax.f32 %v1762_v23, 0.0 }
 0x552   :  { %v1757_v30 = vadd.f32 %v3502_v45, %v1756_v29  ;;  %v1844_v34 = vmax.f32 %v1754_v26, 0.0 }
 0x553   :  { %v1847_v33 = vmax.f32 %v1765_v28, 0.0 }
 0x554   :  { %v1845_v35 = vmax.f32 %v1757_v30, 0.0  ;;  %v22_v30 = vstv %s3837_s16 }
 0x555   :  { %v1871_v36 = vpack.c.bf16 %v1847_v33, %v1846_v32  ;;  %23 = vst [vmem:[#allocation2] sm:$0x1] %v22_v30  ;;  %v2193_v32 = vlaneseq }
 0x556   :  { %v1870_v37 = vpack.c.bf16 %v1845_v35, %v1844_v34  ;;  %v2914_v38 = vpop.f32.mrb[96].mxu1  ;;  %v59_v35 = vld [vmem:[%s3839_s15] sm:$0x1] }
 0x557   :  { %v1778_v39 = vadd.f32 %v2914_v38, %v3502_v45  ;;  %v1769_v40 = vpop.f32.mrb[97].mxu1  ;;  %v2194_v33 = vshrl.u32 %v2193_v32, 7 }
 0x558   :  { %v1770_v41 = vadd.f32 %v3502_v45, %v1769_v40  ;;  %v2915_v42 = vpop.f32.mrb[98].mxu1  ;;  %2944 = vmatprep.mubr.msk.bf16.mxu0 %vm1903_vm2, %v1870_v37 }
 0x559   :  { %v1781_v43 = vadd.f32 %v2915_v42, %v3502_v45  ;;  %v1772_v44 = vpop.f32.mrb[99].mxu1  ;;  %2945 = vmatmul.mubr.msk.bf16.gmra.mrb[92].mxu0 %vm1903_vm2, %v1871_v36  ;;  %v1850_v47 = vmax.f32 %v1778_v39, 0.0  ;;  %v60_v42 = vunpack.c.l.bf16 %v59_v35 }
 0x55a   :  { %v1773_v46 = vadd.f32 %v3502_v45, %v1772_v44  ;;  %v1848_v8 = vmax.f32 %v1770_v41, 0.0 }
 0x55b   :  { %v1851_v48 = vmax.f32 %v1781_v43, 0.0  ;;  %v2195_v43 = vsub.s32 0, %v2194_v33 }
 0x55c   :  { %v1849_v49 = vmax.f32 %v1773_v46, 0.0 }
 0x55d   :  { %v1873_v50 = vpack.c.bf16 %v1851_v48, %v1850_v47 }
 0x55e   :  { %v1872_v51 = vpack.c.bf16 %v1849_v49, %v1848_v8  ;;  %v2918_v52 = vpop.f32.mrb[100].mxu1 }
 0x55f   :  { %v1794_v53 = vadd.f32 %v2918_v52, %v3502_v45  ;;  %v1785_v54 = vpop.f32.mrb[101].mxu1 }
 0x560   :  { %v1786_v55 = vadd.f32 %v3502_v45, %v1785_v54  ;;  %v2919_v56 = vpop.f32.mrb[102].mxu1  ;;  %2948 = vmatprep.mubr.msk.bf16.mxu0 %vm1903_vm2, %v1872_v51 }
 0x561   :  { %v1797_v57 = vadd.f32 %v2919_v56, %v3502_v45  ;;  %v1788_v58 = vpop.f32.mrb[103].mxu1  ;;  %2949 = vmatmul.mubr.msk.bf16.gmra.mrb[96].mxu0 %vm1903_vm2, %v1873_v50  ;;  %v1854_v60 = vmax.f32 %v1794_v53, 0.0  ;;  %v3567_v50 = vrot.slane %v60_v42, %v2195_v43 }
 0x562   :  { %v1789_v59 = vadd.f32 %v3502_v45, %v1788_v58  ;;  %v1852_v62 = vmax.f32 %v1786_v55, 0.0 }
 0x563   :  { %v1855_v61 = vmax.f32 %v1797_v57, 0.0 }
 0x564   :  { %v1853_v63 = vmax.f32 %v1789_v59, 0.0 }
 0x565   :  { %v1875_v0 = vpack.c.bf16 %v1855_v61, %v1854_v60 }
 0x566   :  { %v1874_v1 = vpack.c.bf16 %v1853_v63, %v1852_v62  ;;  %v2922_v2 = vpop.f32.mrb[104].mxu1 }
 0x567   :  { %v1810_v3 = vadd.f32 %v2922_v2, %v3502_v45  ;;  %v1801_v5 = vpop.f32.mrb[105].mxu1 }
 0x568   :  { %v1802_v18 = vadd.f32 %v3502_v45, %v1801_v5  ;;  %v2923_v6 = vpop.f32.mrb[106].mxu1  ;;  %2952 = vmatprep.mubr.msk.bf16.mxu0 %vm1903_vm2, %v1874_v1 }
 0x569   :  { %v1813_v9 = vadd.f32 %v2923_v6, %v3502_v45  ;;  %v1804_v10 = vpop.f32.mrb[107].mxu1  ;;  %2953 = vmatmul.mubr.msk.bf16.gmra.mrb[100].mxu0 %vm1903_vm2, %v1875_v0  ;;  %v1858_v12 = vmax.f32 %v1810_v3, 0.0 }
 0x56a   :  { %v1805_v11 = vadd.f32 %v3502_v45, %v1804_v10  ;;  %v1856_v14 = vmax.f32 %v1802_v18, 0.0 }
 0x56b   :  { %v1859_v13 = vmax.f32 %v1813_v9, 0.0 }
 0x56c   :  { %v1857_v15 = vmax.f32 %v1805_v11, 0.0 }
 0x56d   :  { %v1877_v25 = vpack.c.bf16 %v1859_v13, %v1858_v12 }
 0x56e   :  { %v1876_v16 = vpack.c.bf16 %v1857_v15, %v1856_v14  ;;  %v2926_v17 = vpop.f32.mrb[108].mxu1 }
 0x56f   :  { %v1826_v19 = vadd.f32 %v2926_v17, %v3502_v45  ;;  %v1817_v31 = vpop.f32.mrb[109].mxu1 }
 0x570   :  { %v1818_v4 = vadd.f32 %v3502_v45, %v1817_v31  ;;  %v2927_v7 = vpop.f32.mrb[110].mxu1  ;;  %2956 = vmatprep.mubr.msk.bf16.mxu0 %vm1903_vm2, %v1876_v16 }
 0x571   :  { %v1829_v20 = vadd.f32 %v2927_v7, %v3502_v45  ;;  %v1820_v21 = vpop.f32.mrb[111].mxu1  ;;  %2957 = vmatmul.mubr.msk.bf16.gmra.mrb[104].mxu0 %vm1903_vm2, %v1877_v25  ;;  %v1862_v23 = vmax.f32 %v1826_v19, 0.0 }
 0x572   :  { %v1821_v22 = vadd.f32 %v3502_v45, %v1820_v21  ;;  %v1860_v26 = vmax.f32 %v1818_v4, 0.0  ;;  %v3558_v45 = vld [vmem:[%s3838_s14] ss:$0 sm:$0xff] }
 0x573   :  { %v1863_v24 = vmax.f32 %v1829_v20, 0.0 }
 0x574   :  { %v1861_v27 = vmax.f32 %v1821_v22, 0.0 }
 0x575   :  { %v1879_v28 = vpack.c.bf16 %v1863_v24, %v1862_v23 }
 0x576   :  { %v1878_v29 = vpack.c.bf16 %v1861_v27, %v1860_v26 }
 0x578   :  { %2960 = vmatprep.mubr.msk.bf16.mxu0 %vm1903_vm2, %v1878_v29 }
 0x579   :  { %2961 = vmatmul.mubr.msk.bf16.gmra.mrb[108].mxu0 %vm1903_vm2, %v1879_v28 }
 0x614   :  { %v2934_v34 = vpop.f32.mrb[80].mxu0 }
 0x615   :  { %v1995_v36 = vadd.f32 %v2934_v34, %v3558_v45  ;;  %v1986_v37 = vpop.f32.mrb[81].mxu0 }
 0x616   :  { %v1987_v38 = vadd.f32 %v3558_v45, %v1986_v37  ;;  %v2935_v39 = vpop.f32.mrb[82].mxu0 }
 0x617   :  { %v1998_v40 = vadd.f32 %v2935_v39, %v3558_v45  ;;  %v1989_v41 = vpop.f32.mrb[83].mxu0  ;;  %v2115_v46 = vmax.f32 %v1995_v36, 0.0 }
 0x618   :  { %v1990_v44 = vadd.f32 %v3558_v45, %v1989_v41  ;;  %v2113_v48 = vmax.f32 %v1987_v38, 0.0 }
 0x619   :  { %v2116_v47 = vmax.f32 %v1998_v40, 0.0 }
 0x61a   :  { %v2114_v8 = vmax.f32 %v1990_v44, 0.0 }
 0x61b   :  { %v2146_v49 = vpack.c.bf16 %v2116_v47, %v2115_v46 }
 0x61c   :  { %v2145_v51 = vpack.c.bf16 %v2114_v8, %v2113_v48  ;;  %v2938_v52 = vpop.f32.mrb[84].mxu0 }
 0x61d   :  { %v2011_v53 = vadd.f32 %v2938_v52, %v3558_v45  ;;  %v2002_v54 = vpop.f32.mrb[85].mxu0  ;;  %v2163_v55 = vunpack.c.l.bf16 %v2146_v49  ;;  %v2164_v56 = vunpack.c.h.bf16 %v2146_v49 }
 0x61e   :  { %v2003_v57 = vadd.f32 %v3558_v45, %v2002_v54  ;;  %v2939_v58 = vpop.f32.mrb[86].mxu0  ;;  %v2161_v59 = vunpack.c.l.bf16 %v2145_v51  ;;  %v2162_v60 = vunpack.c.h.bf16 %v2145_v51 }
 0x61f   :  { %v2014_v61 = vadd.f32 %v2939_v58, %v3558_v45  ;;  %v2005_v62 = vpop.f32.mrb[87].mxu0  ;;  %v2199_v63 = vmul.f32 %v3567_v50, %v2163_v55  ;;  %v2119_v2 = vmax.f32 %v2011_v53, 0.0  ;;  %v2200_v18 = vmul.f32 %v3567_v50, %v2164_v56 }
 0x620   :  { %v2006_v0 = vadd.f32 %v3558_v45, %v2005_v62  ;;  %v2197_v1 = vmul.f32 %v3567_v50, %v2161_v59  ;;  %v2117_v6 = vmax.f32 %v2003_v57, 0.0  ;;  %v2198_v11 = vmul.f32 %v3567_v50, %v2162_v60 }
 0x621   :  { %v2120_v3 = vmax.f32 %v2014_v61, 0.0  ;;  %v2235_v5 = vsel %vm189_vm0, %v2199_v63, 0.0  ;;  %v2238_v16 = vsel %vm189_vm0, %v2200_v18, 0.0 }
 0x622   :  { %v2118_v9 = vmax.f32 %v2006_v0, 0.0  ;;  %2236 = vadd.xlane.f32.xlu1 %v2235_v5  ;;  %v2229_v10 = vsel %vm189_vm0, %v2197_v1, 0.0  ;;  %v2232_v7 = vsel %vm189_vm0, %v2198_v11, 0.0 }
 0x623   :  { %v2148_v12 = vpack.c.bf16 %v2120_v3, %v2119_v2  ;;  %2230 = vadd.xlane.f32.xlu0 %v2229_v10 }
 0x624   :  { %v2147_v13 = vpack.c.bf16 %v2118_v9, %v2117_v6  ;;  %v2942_v14 = vpop.f32.mrb[88].mxu0 }
 0x625   :  { %v2027_v15 = vadd.f32 %v2942_v14, %v3558_v45  ;;  %v2018_v25 = vpop.f32.mrb[89].mxu0  ;;  %v2168_v17 = vunpack.c.h.bf16 %v2148_v12  ;;  %v2167_v19 = vunpack.c.l.bf16 %v2148_v12 }
 0x626   :  { %v2019_v31 = vadd.f32 %v3558_v45, %v2018_v25  ;;  %2239 = vadd.xlane.f32.xlu1 %v2238_v16  ;;  %v2943_v4 = vpop.f32.mrb[90].mxu0  ;;  %v2166_v20 = vunpack.c.h.bf16 %v2147_v13  ;;  %v2165_v21 = vunpack.c.l.bf16 %v2147_v13 }
 0x627   :  { %v2030_v22 = vadd.f32 %v2943_v4, %v3558_v45  ;;  %v2021_v23 = vpop.f32.mrb[91].mxu0  ;;  %2233 = vadd.xlane.f32.xlu0 %v2232_v7  ;;  %v2204_v24 = vmul.f32 %v3567_v50, %v2168_v17  ;;  %v2203_v26 = vmul.f32 %v3567_v50, %v2167_v19  ;;  %v2123_v27 = vmax.f32 %v2027_v15, 0.0 }
 0x628   :  { %v2022_v28 = vadd.f32 %v3558_v45, %v2021_v23  ;;  %v2202_v33 = vmul.f32 %v3567_v50, %v2166_v20  ;;  %v2121_v34 = vmax.f32 %v2019_v31, 0.0  ;;  %v2201_v36 = vmul.f32 %v3567_v50, %v2165_v21 }
 0x629   :  { %v2124_v29 = vmax.f32 %v2030_v22, 0.0  ;;  %v2250_v30 = vsel %vm189_vm0, %v2204_v24, 0.0  ;;  %v2247_v32 = vsel %vm189_vm0, %v2203_v26, 0.0 }
 0x62a   :  { %v2122_v35 = vmax.f32 %v2022_v28, 0.0  ;;  %2251 = vadd.xlane.f32.xlu1 %v2250_v30  ;;  %v2244_v42 = vsel %vm189_vm0, %v2202_v33, 0.0  ;;  %v2241_v48 = vsel %vm189_vm0, %v2201_v36, 0.0 }
 0x62b   :  { %v2150_v37 = vpack.c.bf16 %v2124_v29, %v2123_v27  ;;  %2248 = vadd.xlane.f32.xlu0 %v2247_v32 }
 0x62c   :  { %v2149_v38 = vpack.c.bf16 %v2122_v35, %v2121_v34  ;;  %v2946_v39 = vpop.f32.mrb[92].mxu0 }
 0x62d   :  { %v2043_v40 = vadd.f32 %v2946_v39, %v3558_v45  ;;  %v2034_v41 = vpop.f32.mrb[93].mxu0  ;;  %v2172_v43 = vunpack.c.h.bf16 %v2150_v37  ;;  %v2171_v44 = vunpack.c.l.bf16 %v2150_v37 }
 0x62e   :  { %v2035_v46 = vadd.f32 %v3558_v45, %v2034_v41  ;;  %v2947_v47 = vpop.f32.mrb[94].mxu0  ;;  %2245 = vadd.xlane.f32.xlu1 %v2244_v42  ;;  %v2170_v8 = vunpack.c.h.bf16 %v2149_v38  ;;  %v2169_v49 = vunpack.c.l.bf16 %v2149_v38 }
 0x62f   :  { %v2046_v51 = vadd.f32 %v2947_v47, %v3558_v45  ;;  %v2037_v52 = vpop.f32.mrb[95].mxu0  ;;  %2242 = vadd.xlane.f32.xlu0 %v2241_v48  ;;  %v2208_v53 = vmul.f32 %v3567_v50, %v2172_v43  ;;  %v2207_v54 = vmul.f32 %v3567_v50, %v2171_v44  ;;  %v2127_v55 = vmax.f32 %v2043_v40, 0.0 }
 0x630   :  { %v2038_v56 = vadd.f32 %v3558_v45, %v2037_v52  ;;  %v2206_v60 = vmul.f32 %v3567_v50, %v2170_v8  ;;  %v2125_v61 = vmax.f32 %v2035_v46, 0.0  ;;  %v2205_v63 = vmul.f32 %v3567_v50, %v2169_v49 }
 0x631   :  { %v2128_v57 = vmax.f32 %v2046_v51, 0.0  ;;  %v2262_v58 = vsel %vm189_vm0, %v2208_v53, 0.0  ;;  %v2259_v59 = vsel %vm189_vm0, %v2207_v54, 0.0 }
 0x632   :  { %v2126_v62 = vmax.f32 %v2038_v56, 0.0  ;;  %2263 = vadd.xlane.f32.xlu1 %v2262_v58  ;;  %v2256_v18 = vsel %vm189_vm0, %v2206_v60, 0.0  ;;  %v2253_v12 = vsel %vm189_vm0, %v2205_v63, 0.0 }
 0x633   :  { %v2152_v0 = vpack.c.bf16 %v2128_v57, %v2127_v55  ;;  %2260 = vadd.xlane.f32.xlu0 %v2259_v59 }
 0x634   :  { %v2151_v1 = vpack.c.bf16 %v2126_v62, %v2125_v61  ;;  %v2950_v2 = vpop.f32.mrb[96].mxu0 }
 0x635   :  { %v2059_v3 = vadd.f32 %v2950_v2, %v3558_v45  ;;  %v2050_v5 = vpop.f32.mrb[97].mxu0  ;;  %v2176_v6 = vunpack.c.h.bf16 %v2152_v0  ;;  %v2175_v9 = vunpack.c.l.bf16 %v2152_v0 }
 0x636   :  { %v2051_v10 = vadd.f32 %v3558_v45, %v2050_v5  ;;  %v2951_v11 = vpop.f32.mrb[98].mxu0  ;;  %2257 = vadd.xlane.f32.xlu1 %v2256_v18  ;;  %v2174_v13 = vunpack.c.h.bf16 %v2151_v1  ;;  %v2173_v14 = vunpack.c.l.bf16 %v2151_v1 }
 0x637   :  { %v2062_v15 = vadd.f32 %v2951_v11, %v3558_v45  ;;  %v2053_v25 = vpop.f32.mrb[99].mxu0  ;;  %2254 = vadd.xlane.f32.xlu0 %v2253_v12  ;;  %v2212_v16 = vmul.f32 %v3567_v50, %v2176_v6  ;;  %v2211_v17 = vmul.f32 %v3567_v50, %v2175_v9  ;;  %v2131_v19 = vmax.f32 %v2059_v3, 0.0 }
 0x638   :  { %v2054_v31 = vadd.f32 %v3558_v45, %v2053_v25  ;;  %v2210_v21 = vmul.f32 %v3567_v50, %v2174_v13  ;;  %v2129_v22 = vmax.f32 %v2051_v10, 0.0  ;;  %v2209_v24 = vmul.f32 %v3567_v50, %v2173_v14 }
 0x639   :  { %v2132_v4 = vmax.f32 %v2062_v15, 0.0  ;;  %v2274_v7 = vsel %vm189_vm0, %v2212_v16, 0.0  ;;  %v2271_v20 = vsel %vm189_vm0, %v2211_v17, 0.0 }
 0x63a   :  { %v2130_v23 = vmax.f32 %v2054_v31, 0.0  ;;  %2275 = vadd.xlane.f32.xlu1 %v2274_v7  ;;  %v2268_v32 = vsel %vm189_vm0, %v2210_v21, 0.0  ;;  %v2265_v37 = vsel %vm189_vm0, %v2209_v24, 0.0 }
 0x63b   :  { %v2154_v26 = vpack.c.bf16 %v2132_v4, %v2131_v19  ;;  %2272 = vadd.xlane.f32.xlu0 %v2271_v20 }
 0x63c   :  { %v2153_v27 = vpack.c.bf16 %v2130_v23, %v2129_v22  ;;  %v2954_v28 = vpop.f32.mrb[100].mxu0 }
 0x63d   :  { %v2075_v29 = vadd.f32 %v2954_v28, %v3558_v45  ;;  %v2066_v30 = vpop.f32.mrb[101].mxu0  ;;  %v2180_v33 = vunpack.c.h.bf16 %v2154_v26  ;;  %v2179_v34 = vunpack.c.l.bf16 %v2154_v26 }
 0x63e   :  { %v2067_v35 = vadd.f32 %v3558_v45, %v2066_v30  ;;  %v2955_v36 = vpop.f32.mrb[102].mxu0  ;;  %2269 = vadd.xlane.f32.xlu1 %v2268_v32  ;;  %v2178_v38 = vunpack.c.h.bf16 %v2153_v27  ;;  %v2177_v39 = vunpack.c.l.bf16 %v2153_v27 }
 0x63f   :  { %v2078_v40 = vadd.f32 %v2955_v36, %v3558_v45  ;;  %v2069_v41 = vpop.f32.mrb[103].mxu0  ;;  %2266 = vadd.xlane.f32.xlu0 %v2265_v37  ;;  %v2216_v42 = vmul.f32 %v3567_v50, %v2180_v33  ;;  %v2215_v43 = vmul.f32 %v3567_v50, %v2179_v34  ;;  %v2135_v44 = vmax.f32 %v2075_v29, 0.0 }
 0x640   :  { %v2070_v46 = vadd.f32 %v3558_v45, %v2069_v41  ;;  %v2214_v49 = vmul.f32 %v3567_v50, %v2178_v38  ;;  %v2133_v51 = vmax.f32 %v2067_v35, 0.0  ;;  %v2213_v53 = vmul.f32 %v3567_v50, %v2177_v39 }
 0x641   :  { %v2136_v47 = vmax.f32 %v2078_v40, 0.0  ;;  %v2286_v48 = vsel %vm189_vm0, %v2216_v42, 0.0  ;;  %v2283_v8 = vsel %vm189_vm0, %v2215_v43, 0.0 }
 0x642   :  { %v2134_v52 = vmax.f32 %v2070_v46, 0.0  ;;  %2287 = vadd.xlane.f32.xlu1 %v2286_v48  ;;  %v2280_v59 = vsel %vm189_vm0, %v2214_v49, 0.0  ;;  %v2277_v0 = vsel %vm189_vm0, %v2213_v53, 0.0 }
 0x643   :  { %v2156_v54 = vpack.c.bf16 %v2136_v47, %v2135_v44  ;;  %2284 = vadd.xlane.f32.xlu0 %v2283_v8 }
 0x644   :  { %v2155_v55 = vpack.c.bf16 %v2134_v52, %v2133_v51  ;;  %v2958_v56 = vpop.f32.mrb[104].mxu0 }
 0x645   :  { %v2091_v57 = vadd.f32 %v2958_v56, %v3558_v45  ;;  %v2082_v58 = vpop.f32.mrb[105].mxu0  ;;  %v2184_v60 = vunpack.c.h.bf16 %v2156_v54  ;;  %v2183_v61 = vunpack.c.l.bf16 %v2156_v54 }
 0x646   :  { %v2083_v62 = vadd.f32 %v3558_v45, %v2082_v58  ;;  %v2959_v63 = vpop.f32.mrb[106].mxu0  ;;  %2281 = vadd.xlane.f32.xlu1 %v2280_v59  ;;  %v2182_v1 = vunpack.c.h.bf16 %v2155_v55  ;;  %v2181_v2 = vunpack.c.l.bf16 %v2155_v55  ;;  %v3661_v59 = vld [vmem:[#allocation2] ss:$0 sm:$0xff] }
 0x647   :  { %v2094_v3 = vadd.f32 %v2959_v63, %v3558_v45  ;;  %v2085_v5 = vpop.f32.mrb[107].mxu0  ;;  %2278 = vadd.xlane.f32.xlu0 %v2277_v0  ;;  %v2220_v18 = vmul.f32 %v3567_v50, %v2184_v60  ;;  %v2219_v6 = vmul.f32 %v3567_v50, %v2183_v61  ;;  %v2139_v9 = vmax.f32 %v2091_v57, 0.0 }
 0x648   :  { %v2086_v10 = vadd.f32 %v3558_v45, %v2085_v5  ;;  %v2218_v14 = vmul.f32 %v3567_v50, %v2182_v1  ;;  %v2137_v15 = vmax.f32 %v2083_v62, 0.0  ;;  %v2217_v16 = vmul.f32 %v3567_v50, %v2181_v2 }
 0x649   :  { %v2140_v11 = vmax.f32 %v2094_v3, 0.0  ;;  %v2298_v12 = vsel %vm189_vm0, %v2220_v18, 0.0  ;;  %v2295_v13 = vsel %vm189_vm0, %v2219_v6, 0.0 }
 0x64a   :  { %v2138_v25 = vmax.f32 %v2086_v10, 0.0  ;;  %2299 = vadd.xlane.f32.xlu1 %v2298_v12  ;;  %v2292_v20 = vsel %vm189_vm0, %v2218_v14, 0.0  ;;  %v2289_v26 = vsel %vm189_vm0, %v2217_v16, 0.0 }
 0x64b   :  { %v2158_v17 = vpack.c.bf16 %v2140_v11, %v2139_v9  ;;  %2296 = vadd.xlane.f32.xlu0 %v2295_v13 }
 0x64c   :  { %v2157_v19 = vpack.c.bf16 %v2138_v25, %v2137_v15  ;;  %v2962_v31 = vpop.f32.mrb[108].mxu0 }
 0x64d   :  { %v2107_v4 = vadd.f32 %v2962_v31, %v3558_v45  ;;  %v2098_v7 = vpop.f32.mrb[109].mxu0  ;;  %v2188_v21 = vunpack.c.h.bf16 %v2158_v17  ;;  %v2187_v22 = vunpack.c.l.bf16 %v2158_v17 }
 0x64e   :  { %v2099_v23 = vadd.f32 %v3558_v45, %v2098_v7  ;;  %v2963_v24 = vpop.f32.mrb[110].mxu0  ;;  %2293 = vadd.xlane.f32.xlu1 %v2292_v20  ;;  %v2186_v27 = vunpack.c.h.bf16 %v2157_v19  ;;  %v2185_v28 = vunpack.c.l.bf16 %v2157_v19 }
 0x64f   :  { %v2110_v29 = vadd.f32 %v2963_v24, %v3558_v45  ;;  %v2101_v30 = vpop.f32.mrb[111].mxu0  ;;  %2290 = vadd.xlane.f32.xlu0 %v2289_v26  ;;  %v2224_v32 = vmul.f32 %v3567_v50, %v2188_v21  ;;  %v2223_v33 = vmul.f32 %v3567_v50, %v2187_v22  ;;  %v2143_v34 = vmax.f32 %v2107_v4, 0.0 }
 0x650   :  { %v2102_v35 = vadd.f32 %v3558_v45, %v2101_v30  ;;  %v2222_v36 = vmul.f32 %v3567_v50, %v2186_v27  ;;  %v2221_v40 = vmul.f32 %v3567_v50, %v2185_v28  ;;  %v2141_v41 = vmax.f32 %v2099_v23, 0.0 }
 0x651   :  { %v2144_v37 = vmax.f32 %v2110_v29, 0.0  ;;  %v2310_v38 = vsel %vm189_vm0, %v2224_v32, 0.0  ;;  %v2307_v39 = vsel %vm189_vm0, %v2223_v33, 0.0 }
 0x652   :  { %v2142_v42 = vmax.f32 %v2102_v35, 0.0  ;;  %2311 = vadd.xlane.f32.xlu1 %v2310_v38  ;;  %v2304_v46 = vsel %vm189_vm0, %v2222_v36, 0.0  ;;  %v2301_v47 = vsel %vm189_vm0, %v2221_v40, 0.0 }
 0x653   :  { %v2160_v43 = vpack.c.bf16 %v2144_v37, %v2143_v34  ;;  %2308 = vadd.xlane.f32.xlu0 %v2307_v39 }
 0x654   :  { %v2159_v44 = vpack.c.bf16 %v2142_v42, %v2141_v41 }
 0x655   :  { %v2192_v8 = vunpack.c.h.bf16 %v2160_v43  ;;  %v2191_v49 = vunpack.c.l.bf16 %v2160_v43 }
 0x656   :  { %2305 = vadd.xlane.f32.xlu1 %v2304_v46  ;;  %v2190_v45 = vunpack.c.h.bf16 %v2159_v44  ;;  %v2189_v48 = vunpack.c.l.bf16 %v2159_v44 }
 0x657   :  { %2302 = vadd.xlane.f32.xlu0 %v2301_v47  ;;  %v2228_v55 = vmul.f32 %v3567_v50, %v2192_v8  ;;  %v2227_v56 = vmul.f32 %v3567_v50, %v2191_v49 }
 0x658   :  { %v2226_v51 = vmul.f32 %v3567_v50, %v2190_v45  ;;  %v2225_v52 = vmul.f32 %v3567_v50, %v2189_v48 }
 0x659   :  { %v2322_v57 = vsel %vm189_vm0, %v2228_v55, 0.0  ;;  %v2319_v58 = vsel %vm189_vm0, %v2227_v56, 0.0 }
 0x65a   :  { %v2316_v53 = vsel %vm189_vm0, %v2226_v51, 0.0  ;;  %v2313_v54 = vsel %vm189_vm0, %v2225_v52, 0.0 }
 0x65b   :  { %2317 = vadd.xlane.f32.xlu1 %v2316_v53  ;;  %2314 = vadd.xlane.f32.xlu0 %v2313_v54 }
 0x65f   :  { %2323 = vadd.xlane.f32.xlu1 %v2322_v57  ;;  %2320 = vadd.xlane.f32.xlu0 %v2319_v58 }
 0x6af   :  { %v2237_v60 = vpop.xlane.xlu1 %2236 }
 0x6b0   :  { %v2333_v61 = vadd.f32 %v3661_v59, %v2237_v60  ;;  %v2231_v62 = vpop.xlane.xlu0 %2230 }
 0x6b1   :  { %v2331_v63 = vadd.f32 %v3661_v59, %v2231_v62 }
 0x6b2   :  { %2366 = vst.msk [vmem:[%s3840_s17 + $0x10] sm:$0xff] %vm2363_vm3, %v2333_v61 }
 0x6b3   :  { %2364 = vst.msk [vmem:[%s3840_s17] sm:$0xff] %vm2363_vm3, %v2331_v63  ;;  %v2240_v50 = vpop.xlane.xlu1 %2239 }
 0x6b4   :  { %v2334_v0 = vadd.f32 %v3661_v59, %v2240_v50  ;;  %v2234_v1 = vpop.xlane.xlu0 %2233 }
 0x6b5   :  { %v2332_v2 = vadd.f32 %v3661_v59, %v2234_v1 }
 0x6b6   :  { %2367 = vst.msk [vmem:[%s3840_s17 + $0x18] sm:$0xff] %vm2363_vm3, %v2334_v0 }
 0x6b7   :  { %2365 = vst.msk [vmem:[%s3840_s17 + $0x8] sm:$0xff] %vm2363_vm3, %v2332_v2  ;;  %v2252_v3 = vpop.xlane.xlu1 %2251 }
 0x6b8   :  { %v2338_v5 = vadd.f32 %v3661_v59, %v2252_v3  ;;  %v2249_v18 = vpop.xlane.xlu0 %2248 }
 0x6b9   :  { %v2337_v6 = vadd.f32 %v3661_v59, %v2249_v18 }
 0x6ba   :  { %2371 = vst.msk [vmem:[%s3840_s17 + $0x38] sm:$0xff] %vm2363_vm3, %v2338_v5 }
 0x6bb   :  { %2370 = vst.msk [vmem:[%s3840_s17 + $0x30] sm:$0xff] %vm2363_vm3, %v2337_v6  ;;  %v2246_v9 = vpop.xlane.xlu1 %2245 }
 0x6bc   :  { %v2336_v10 = vadd.f32 %v3661_v59, %v2246_v9  ;;  %v2243_v11 = vpop.xlane.xlu0 %2242 }
 0x6bd   :  { %v2335_v12 = vadd.f32 %v3661_v59, %v2243_v11 }
 0x6be   :  { %2369 = vst.msk [vmem:[%s3840_s17 + $0x28] sm:$0xff] %vm2363_vm3, %v2336_v10 }
 0x6bf   :  { %2368 = vst.msk [vmem:[%s3840_s17 + $0x20] sm:$0xff] %vm2363_vm3, %v2335_v12  ;;  %v2264_v13 = vpop.xlane.xlu1 %2263 }
 0x6c0   :  { %v2342_v14 = vadd.f32 %v3661_v59, %v2264_v13  ;;  %v2261_v15 = vpop.xlane.xlu0 %2260 }
 0x6c1   :  { %v2341_v25 = vadd.f32 %v3661_v59, %v2261_v15 }
 0x6c2   :  { %2375 = vst.msk [vmem:[%s3840_s17 + $0x58] sm:$0xff] %vm2363_vm3, %v2342_v14 }
 0x6c3   :  { %2374 = vst.msk [vmem:[%s3840_s17 + $0x50] sm:$0xff] %vm2363_vm3, %v2341_v25  ;;  %v2258_v16 = vpop.xlane.xlu1 %2257 }
 0x6c4   :  { %v2340_v17 = vadd.f32 %v3661_v59, %v2258_v16  ;;  %v2255_v19 = vpop.xlane.xlu0 %2254 }
 0x6c5   :  { %v2339_v31 = vadd.f32 %v3661_v59, %v2255_v19 }
 0x6c6   :  { %2373 = vst.msk [vmem:[%s3840_s17 + $0x48] sm:$0xff] %vm2363_vm3, %v2340_v17 }
 0x6c7   :  { %2372 = vst.msk [vmem:[%s3840_s17 + $0x40] sm:$0xff] %vm2363_vm3, %v2339_v31  ;;  %v2276_v4 = vpop.xlane.xlu1 %2275 }
 0x6c8   :  { %v2346_v7 = vadd.f32 %v3661_v59, %v2276_v4  ;;  %v2273_v20 = vpop.xlane.xlu0 %2272 }
 0x6c9   :  { %v2345_v21 = vadd.f32 %v3661_v59, %v2273_v20 }
 0x6ca   :  { %2379 = vst.msk [vmem:[%s3840_s17 + $0x78] sm:$0xff] %vm2363_vm3, %v2346_v7 }
 0x6cb   :  { %2378 = vst.msk [vmem:[%s3840_s17 + $0x70] sm:$0xff] %vm2363_vm3, %v2345_v21  ;;  %v2270_v22 = vpop.xlane.xlu1 %2269 }
 0x6cc   :  { %v2344_v23 = vadd.f32 %v3661_v59, %v2270_v22  ;;  %v2267_v24 = vpop.xlane.xlu0 %2266 }
 0x6cd   :  { %v2343_v26 = vadd.f32 %v3661_v59, %v2267_v24 }
 0x6ce   :  { %2377 = vst.msk [vmem:[%s3840_s17 + $0x68] sm:$0xff] %vm2363_vm3, %v2344_v23 }
 0x6cf   :  { %2376 = vst.msk [vmem:[%s3840_s17 + $0x60] sm:$0xff] %vm2363_vm3, %v2343_v26  ;;  %v2288_v27 = vpop.xlane.xlu1 %2287 }
 0x6d0   :  { %v2350_v28 = vadd.f32 %v3661_v59, %v2288_v27  ;;  %v2285_v29 = vpop.xlane.xlu0 %2284 }
 0x6d1   :  { %v2349_v30 = vadd.f32 %v3661_v59, %v2285_v29 }
 0x6d2   :  { %2383 = vst.msk [vmem:[%s3840_s17 + $0x98] sm:$0xff] %vm2363_vm3, %v2350_v28 }
 0x6d3   :  { %2382 = vst.msk [vmem:[%s3840_s17 + $0x90] sm:$0xff] %vm2363_vm3, %v2349_v30  ;;  %v2282_v32 = vpop.xlane.xlu1 %2281 }
 0x6d4   :  { %v2348_v33 = vadd.f32 %v3661_v59, %v2282_v32  ;;  %v2279_v34 = vpop.xlane.xlu0 %2278 }
 0x6d5   :  { %v2347_v35 = vadd.f32 %v3661_v59, %v2279_v34 }
 0x6d6   :  { %2381 = vst.msk [vmem:[%s3840_s17 + $0x88] sm:$0xff] %vm2363_vm3, %v2348_v33 }
 0x6d7   :  { %2380 = vst.msk [vmem:[%s3840_s17 + $0x80] sm:$0xff] %vm2363_vm3, %v2347_v35  ;;  %v2300_v36 = vpop.xlane.xlu1 %2299 }
 0x6d8   :  { %v2354_v37 = vadd.f32 %v3661_v59, %v2300_v36  ;;  %v2297_v38 = vpop.xlane.xlu0 %2296 }
 0x6d9   :  { %v2353_v39 = vadd.f32 %v3661_v59, %v2297_v38 }
 0x6da   :  { %2387 = vst.msk [vmem:[%s3840_s17 + $0xb8] sm:$0xff] %vm2363_vm3, %v2354_v37 }
 0x6db   :  { %2386 = vst.msk [vmem:[%s3840_s17 + $0xb0] sm:$0xff] %vm2363_vm3, %v2353_v39  ;;  %v2294_v40 = vpop.xlane.xlu1 %2293 }
 0x6dc   :  { %v2352_v41 = vadd.f32 %v3661_v59, %v2294_v40  ;;  %v2291_v42 = vpop.xlane.xlu0 %2290 }
 0x6dd   :  { %v2351_v43 = vadd.f32 %v3661_v59, %v2291_v42 }
 0x6de   :  { %2385 = vst.msk [vmem:[%s3840_s17 + $0xa8] sm:$0xff] %vm2363_vm3, %v2352_v41 }
 0x6df   :  { %2384 = vst.msk [vmem:[%s3840_s17 + $0xa0] sm:$0xff] %vm2363_vm3, %v2351_v43  ;;  %v2312_v44 = vpop.xlane.xlu1 %2311 }
 0x6e0   :  { %v2358_v46 = vadd.f32 %v3661_v59, %v2312_v44  ;;  %v2309_v47 = vpop.xlane.xlu0 %2308 }
 0x6e1   :  { %v2357_v45 = vadd.f32 %v3661_v59, %v2309_v47 }
 0x6e2   :  { %2391 = vst.msk [vmem:[%s3840_s17 + $0xd8] sm:$0xff] %vm2363_vm3, %v2358_v46 }
 0x6e3   :  { %2390 = vst.msk [vmem:[%s3840_s17 + $0xd0] sm:$0xff] %vm2363_vm3, %v2357_v45  ;;  %v2306_v48 = vpop.xlane.xlu1 %2305 }
 0x6e4   :  { %v2356_v8 = vadd.f32 %v3661_v59, %v2306_v48  ;;  %v2303_v49 = vpop.xlane.xlu0 %2302 }
 0x6e5   :  { %v2355_v51 = vadd.f32 %v3661_v59, %v2303_v49 }
 0x6e6   :  { %2389 = vst.msk [vmem:[%s3840_s17 + $0xc8] sm:$0xff] %vm2363_vm3, %v2356_v8 }
 0x6e7   :  { %2388 = vst.msk [vmem:[%s3840_s17 + $0xc0] sm:$0xff] %vm2363_vm3, %v2355_v51 }
 0x6e8   :  { %v2318_v52 = vpop.xlane.xlu1 %2317  ;;  %v2315_v53 = vpop.xlane.xlu0 %2314 }
 0x6e9   :  { %v2360_v54 = vadd.f32 %v3661_v59, %v2318_v52  ;;  %v2359_v55 = vadd.f32 %v3661_v59, %v2315_v53 }
 0x6eb   :  { %2393 = vst.msk [vmem:[%s3840_s17 + $0xe8] sm:$0xff] %vm2363_vm3, %v2360_v54  ;;  %2392 = vst.msk [vmem:[%s3840_s17 + $0xe0] sm:$0xff] %vm2363_vm3, %v2359_v55 }
 0x6ec   :  { %v2324_v56 = vpop.xlane.xlu1 %2323  ;;  %v2321_v57 = vpop.xlane.xlu0 %2320 }
 0x6ed   :  { %v2362_v58 = vadd.f32 %v3661_v59, %v2324_v56  ;;  %v2361_v60 = vadd.f32 %v3661_v59, %v2321_v57 }
 0x6ef   :  { %2395 = vst.msk [vmem:[%s3840_s17 + $0xf8] sm:$0xff] %vm2363_vm3, %v2362_v58  ;;  %2394 = vst.msk [vmem:[%s3840_s17 + $0xf0] sm:$0xff] %vm2363_vm3, %v2361_v60 }

</bundles_post_ra>
